<compile_context>
chip_gen: v7x
topology: tpu7x:2x2x1
jax: 0.10.0
libtpu: 0.0.40
codegen_flags: <defaults>
</compile_context>

<pallas_src>
import math

import jax
import jax.numpy as jnp
from jax import lax
from jax.experimental import pallas as pl
from jax.experimental.pallas import tpu as pltpu

xi_feasible_range = (0.0, 1.0)
LANES = 128

CFG = dict(
    dim_t=16, dim_z_add=1, dim_z_aux1=4, dim_z_aux2=4,
    range_xi=(0.0, 1.0), activation='relu', dt=0.1, intg_lev=1,
    ode_solver='euler', no_phy=False, x_lnvar=-2.0,
    arch_feat='mlp', num_units_feat=32,
    hidlayers_feat=[32], hidlayers_aux1_enc=[32], hidlayers_aux2_enc=[32],
    hidlayers_unmixer=[32], hidlayers_xi=[32],
    hidlayers_aux1_dec=[32], hidlayers_aux2_dec=[32],
)


# ----------------------------- parameter init (PyTorch nn.Linear style) -----------------------------
def _linear(key, din, dout):
    """PyTorch-style nn.Linear init, stored as (in, out) / (1, out)."""
    k1, k2 = jax.random.split(key)
    bound = 1.0 / math.sqrt(din)
    W = jax.random.uniform(k1, (din, dout), jnp.float32, -bound, bound)
    b = jax.random.uniform(k2, (1, dout), jnp.float32, -bound, bound)
    return W, b


def init_params(key, cfg):
    dim_t = cfg['dim_t']
    H = cfg['num_units_feat']
    dz1, dz2, dzadd = cfg['dim_z_aux1'], cfg['dim_z_aux2'], cfg['dim_z_add']
    ks = list(jax.random.split(key, 16))
    P = {}

    def mlp2(k, name, din, dh, dout):
        ka, kb = jax.random.split(k)
        P[name + '_W1'], P[name + '_b1'] = _linear(ka, din, dh)
        P[name + '_W2'], P[name + '_b2'] = _linear(kb, dh, dout)

    # --- Encoders ---
    mlp2(ks[0], 'feat1', dim_t, cfg['hidlayers_feat'][0], H)          # func_feat_aux1
    mlp2(ks[1], 'z1m', H, cfg['hidlayers_aux1_enc'][0], dz1)          # func_z_aux1_mean
    mlp2(ks[2], 'z1l', H, cfg['hidlayers_aux1_enc'][0], dz1)          # func_z_aux1_lnvar
    mlp2(ks[3], 'feat2', dim_t, cfg['hidlayers_feat'][0], H)          # func_feat_aux2
    mlp2(ks[4], 'z2m', H, cfg['hidlayers_aux2_enc'][0], dz2)          # func_z_aux2_mean
    mlp2(ks[5], 'z2l', H, cfg['hidlayers_aux2_enc'][0], dz2)          # func_z_aux2_lnvar

    # func_unmixer_res : input cat(x, z1_mean, z2_mean); split first-layer W by input block
    ka, kb = jax.random.split(ks[6])
    Wu1, bu1 = _linear(ka, dim_t + dz1 + dz2, cfg['hidlayers_unmixer'][0])
    Wu2, bu2 = _linear(kb, cfg['hidlayers_unmixer'][0], dim_t)
    P['unmix_W1x'] = Wu1[:dim_t]
    P['unmix_W1z1'] = Wu1[dim_t:dim_t + dz1]
    P['unmix_W1z2'] = Wu1[dim_t + dz1:]
    P['unmix_b1'], P['unmix_W2'], P['unmix_b2'] = bu1, Wu2, bu2

    mlp2(ks[7], 'featp', dim_t, cfg['hidlayers_feat'][0], H)          # func_feat_phy
    mlp2(ks[8], 'xim', H, cfg['hidlayers_xi'][0], 1)                  # func_xi_mean (+softplus)
    mlp2(ks[9], 'xil', H, cfg['hidlayers_xi'][0], 1)                  # func_xi_lnvar

    # --- Decoders ---
    # func_aux1 : input cat(z_aux1, y)  (dim_z_add == 1 path)
    ka, kb = jax.random.split(ks[10])
    Wa1, ba1 = _linear(ka, dz1 + dzadd, cfg['hidlayers_aux1_dec'][0])
    Wa2, ba2 = _linear(kb, cfg['hidlayers_aux1_dec'][0], 1)
    P['aux1_W1z'] = Wa1[:dz1]
    P['aux1_W1y'] = Wa1[dz1:]              # (1, hid)
    P['aux1_b1'], P['aux1_W2'], P['aux1_b2'] = ba1, Wa2, ba2

    # func_aux2_res : input cat(xi, z_aux1, z_aux2) -> 400
    ka, kb = jax.random.split(ks[11])
    Wr1, br1 = _linear(ka, 1 + dz1 + dz2, cfg['hidlayers_aux2_dec'][0])
    Wr2, br2 = _linear(kb, cfg['hidlayers_aux2_dec'][0], 400)
    P['res_W1xi'] = Wr1[:1]                # (1, hid)
    P['res_W1z1'] = Wr1[1:1 + dz1]
    P['res_W1z2'] = Wr1[1 + dz1:]
    P['res_b1'], P['res_W2'], P['res_b2'] = br1, Wr2, br2
    return P


# ----------------------------- shared math helpers -----------------------------
def _relu(a):
    return jnp.maximum(a, 0.0)


def _softplus(a):
    # numerically stable softplus (== PyTorch nn.Softplus); exp/log run on the EUP.
    return jnp.maximum(a, 0.0) + jnp.log(1.0 + jnp.exp(-jnp.abs(a)))


def _mlp2(x, W1, b1, W2, b2, act_out=False):
    h = _relu(jnp.dot(x, W1, preferred_element_type=jnp.float32) + b1)
    o = jnp.dot(h, W2, preferred_element_type=jnp.float32) + b2
    return _relu(o) if act_out else o


# ----------------------------- plain-JAX reference (unfused math) -----------------------------
def _vae_forward_math(x, P, eps_xi, eps_z1, eps_z2, cfg):
    dim_t = cfg['dim_t']
    intg_lev = cfg['intg_lev']
    dt_intg = cfg['dt'] / float(intg_lev)
    len_intg = (dim_t - 1) * intg_lev + 1
    n = x.shape[0]

    # ------------------ encode ------------------
    feat1 = _mlp2(x, P['feat1_W1'], P['feat1_b1'], P['feat1_W2'], P['feat1_b2'], act_out=True)
    z1_mean = _mlp2(feat1, P['z1m_W1'], P['z1m_b1'], P['z1m_W2'], P['z1m_b2'])
    z1_lnvar = _mlp2(feat1, P['z1l_W1'], P['z1l_b1'], P['z1l_W2'], P['z1l_b2'])

    feat2 = _mlp2(x, P['feat2_W1'], P['feat2_b1'], P['feat2_W2'], P['feat2_b2'], act_out=True)
    z2_mean = _mlp2(feat2, P['z2m_W1'], P['z2m_b1'], P['z2m_W2'], P['z2m_b2'])
    z2_lnvar = _mlp2(feat2, P['z2l_W1'], P['z2l_b1'], P['z2l_W2'], P['z2l_b2'])

    hu = _relu(jnp.dot(x, P['unmix_W1x'], preferred_element_type=jnp.float32)
               + jnp.dot(z1_mean, P['unmix_W1z1'], preferred_element_type=jnp.float32)
               + jnp.dot(z2_mean, P['unmix_W1z2'], preferred_element_type=jnp.float32)
               + P['unmix_b1'])
    unmixed = x + jnp.dot(hu, P['unmix_W2'], preferred_element_type=jnp.float32) + P['unmix_b2']

    feat_phy = _mlp2(unmixed, P['featp_W1'], P['featp_b1'], P['featp_W2'], P['featp_b2'], act_out=True)
    xi_mean = _softplus(_mlp2(feat_phy, P['xim_W1'], P['xim_b1'], P['xim_W2'], P['xim_b2']))
    xi_lnvar = _mlp2(feat_phy, P['xil_W1'], P['xil_b1'], P['xil_W2'], P['xil_b2'])

    # ------------------ draw (reparameterization; deterministic eps) ------------------
    xi = xi_mean + jnp.exp(0.5 * xi_lnvar) * eps_xi
    z_aux1 = z1_mean + jnp.exp(0.5 * z1_lnvar) * eps_z1
    z_aux2 = z2_mean + jnp.exp(0.5 * z2_lnvar) * eps_z2
    xi = jnp.minimum(jnp.maximum(xi, xi_feasible_range[0]), xi_feasible_range[1])

    # ------------------ decode: explicit-Euler ODE ------------------
    init_y = x[:, 0:1]

    def body(k, carry):
        y, v, acc = carry
        col = k // intg_lev
        rec = jnp.where((k % intg_lev) == 0, 1.0, 0.0)
        onehot = (lax.broadcasted_iota(jnp.int32, (1, dim_t), 1) == col).astype(jnp.float32)
        acc = acc + rec * y * onehot
        h1 = _relu(jnp.dot(z_aux1, P['aux1_W1z'], preferred_element_type=jnp.float32)
                   + y * P['aux1_W1y'] + P['aux1_b1'])
        aux = jnp.dot(h1, P['aux1_W2'], preferred_element_type=jnp.float32) + P['aux1_b2']
        dy = v
        dv = -xi * v + aux
        return (y + dt_intg * dy, v + dt_intg * dv, acc)

    acc0 = jnp.zeros((n, dim_t), jnp.float32)
    _, _, y_seq = lax.fori_loop(0, len_intg, body, (init_y, jnp.zeros_like(init_y), acc0))

    hr = _relu(xi * P['res_W1xi']
               + jnp.dot(z_aux1, P['res_W1z1'], preferred_element_type=jnp.float32)
               + jnp.dot(z_aux2, P['res_W1z2'], preferred_element_type=jnp.float32)
               + P['res_b1'])
    residual = jnp.dot(hr, P['res_W2'], preferred_element_type=jnp.float32) + P['res_b2']
    x_mean = y_seq + residual[:, :dim_t]

    return xi_mean, xi_lnvar, z1_mean, z1_lnvar, z2_mean, z2_lnvar, x_mean


# ----------------------------- host-side parameter fusion + slab packing -----------------------------
def _block_diag(a, b):
    ra, ca = a.shape
    rb, cb = b.shape
    out = jnp.zeros((ra + rb, ca + cb), jnp.float32)
    out = out.at[:ra, :ca].set(a)
    out = out.at[ra:, ca:].set(b)
    return out


def pack_params(P, cfg):
    """Fuse sibling MLPs (concat / block-diag weights) and pack everything into ONE
    lane-dense (rows, 128) f32 slab with per-parameter row offsets (multiples of 8)."""
    dim_t = cfg['dim_t']
    H = cfg['num_units_feat']
    dz1, dz2 = cfg['dim_z_aux1'], cfg['dim_z_aux2']
    hz1 = cfg['hidlayers_aux1_enc'][0]
    hz2 = cfg['hidlayers_aux2_enc'][0]

    F = {}
    # fused feature extractors for the aux1 | aux2 branches (both consume x)
    F['featA_W1'] = jnp.concatenate([P['feat1_W1'], P['feat2_W1']], axis=1)       # (dim_t, 2H)
    F['featA_b1'] = jnp.concatenate([P['feat1_b1'], P['feat2_b1']], axis=1)
    F['featA_W2'] = _block_diag(P['feat1_W2'], P['feat2_W2'])                     # (2H, 2H)
    F['featA_b2'] = jnp.concatenate([P['feat1_b2'], P['feat2_b2']], axis=1)

    # fused z heads: hidden layout [z1m_h | z1l_h | z2m_h | z2l_h],
    # output layout zstat = [z1_mean | z2_mean | z1_lnvar | z2_lnvar]
    Wz1 = jnp.zeros((2 * H, 2 * hz1 + 2 * hz2), jnp.float32)
    Wz1 = Wz1.at[:H, 0:hz1].set(P['z1m_W1'])
    Wz1 = Wz1.at[:H, hz1:2 * hz1].set(P['z1l_W1'])
    Wz1 = Wz1.at[H:, 2 * hz1:2 * hz1 + hz2].set(P['z2m_W1'])
    Wz1 = Wz1.at[H:, 2 * hz1 + hz2:].set(P['z2l_W1'])
    F['z_W1'] = Wz1
    F['z_b1'] = jnp.concatenate([P['z1m_b1'], P['z1l_b1'], P['z2m_b1'], P['z2l_b1']], axis=1)
    Wz2 = jnp.zeros((2 * hz1 + 2 * hz2, 2 * dz1 + 2 * dz2), jnp.float32)
    Wz2 = Wz2.at[0:hz1, 0:dz1].set(P['z1m_W2'])
    Wz2 = Wz2.at[hz1:2 * hz1, dz1 + dz2:2 * dz1 + dz2].set(P['z1l_W2'])
    Wz2 = Wz2.at[2 * hz1:2 * hz1 + hz2, dz1:dz1 + dz2].set(P['z2m_W2'])
    Wz2 = Wz2.at[2 * hz1 + hz2:, 2 * dz1 + dz2:].set(P['z2l_W2'])
    F['z_W2'] = Wz2
    F['z_b2'] = jnp.concatenate([P['z1m_b2'], P['z2m_b2'], P['z1l_b2'], P['z2l_b2']], axis=1)

    # unmixer: z path takes the packed zstat; lnvar rows are zeroed so only the means contribute
    F['unmix_W1x'] = P['unmix_W1x']
    Wuz = jnp.zeros((2 * dz1 + 2 * dz2, P['unmix_W1z1'].shape[1]), jnp.float32)
    Wuz = Wuz.at[0:dz1].set(P['unmix_W1z1'])
    Wuz = Wuz.at[dz1:dz1 + dz2].set(P['unmix_W1z2'])
    F['unmix_W1z'] = Wuz
    F['unmix_b1'] = P['unmix_b1']
    F['unmix_W2'] = P['unmix_W2']
    F['unmix_b2'] = P['unmix_b2']

    # phy feature extractor
    F['featp_W1'] = P['featp_W1']
    F['featp_b1'] = P['featp_b1']
    F['featp_W2'] = P['featp_W2']
    F['featp_b2'] = P['featp_b2']

    # fused xi heads -> (n, 2) = [xi_mean_pre, xi_lnvar]
    F['xi_W1'] = jnp.concatenate([P['xim_W1'], P['xil_W1']], axis=1)
    F['xi_b1'] = jnp.concatenate([P['xim_b1'], P['xil_b1']], axis=1)
    F['xi_W2'] = _block_diag(P['xim_W2'], P['xil_W2'])
    F['xi_b2'] = jnp.concatenate([P['xim_b2'], P['xil_b2']], axis=1)

    # decoder func_aux1 (z rows padded with zeros so it consumes the full z_aux draw vector)
    Wa1z = jnp.zeros((dz1 + dz2, P['aux1_W1z'].shape[1]), jnp.float32)
    Wa1z = Wa1z.at[0:dz1].set(P['aux1_W1z'])
    F['aux1_W1z'] = Wa1z
    F['aux1_W1y'] = P['aux1_W1y']               # (1, hid)
    F['aux1_b1'] = P['aux1_b1']
    F['aux1_W2row'] = P['aux1_W2'].T            # (1, hid) -> in-kernel VPU mul + lane reduce
    F['aux1_b2'] = P['aux1_b2']

    # decoder func_aux2_res, second layer pre-sliced from 400 -> dim_t columns
    F['res_W1xi'] = P['res_W1xi']
    F['res_W1z'] = jnp.concatenate([P['res_W1z1'], P['res_W1z2']], axis=0)
    F['res_b1'] = P['res_b1']
    F['res_W2'] = P['res_W2'][:, :dim_t]
    F['res_b2'] = P['res_b2'][:, :dim_t]

    # ---- pack into one lane-dense slab; each param starts at a sublane-aligned row ----
    offsets = {}
    row = 0
    for nm, a in F.items():
        r, c = a.shape
        assert c <= LANES
        offsets[nm] = (row, r, c)
        row += ((r + 7) // 8) * 8
    slab = jnp.zeros((row, LANES), jnp.float32)
    for nm, a in F.items():
        r0, r, c = offsets[nm]
        slab = slab.at[r0:r0 + r, :c].set(a)
    return slab, offsets


# ----------------------------- Pallas kernel -----------------------------
def _make_kernel(cfg, offsets):
    dim_t = cfg['dim_t']
    dz1, dz2 = cfg['dim_z_aux1'], cfg['dim_z_aux2']
    dz = dz1 + dz2
    # TODO(synk): only ode_solver='euler' with intg_lev==1 is implemented
    # (general torchdiffeq solvers / intg_lev>1 not translated).
    assert cfg['ode_solver'] == 'euler' and cfg['intg_lev'] == 1
    dt_intg = cfg['dt'] / float(cfg['intg_lev'])
    len_intg = (dim_t - 1) * cfg['intg_lev'] + 1

    def kernel(data_ref, slab_ref, out_ref):
        def p(name):                      # static slab slice -> direct VMEM load
            r0, r, c = offsets[name]
            return slab_ref[r0:r0 + r, 0:c]

        x = data_ref[:, 0:dim_t]                              # (n, dim_t)
        eps_xi = data_ref[:, dim_t:dim_t + 1]                 # (n, 1)
        eps_z = data_ref[:, dim_t + 1:dim_t + 1 + dz]         # (n, dz1+dz2)
        n = x.shape[0]

        # ---- encode: fused feature extractors (aux1 | aux2) ----
        h = _relu(jnp.dot(x, p('featA_W1'), preferred_element_type=jnp.float32) + p('featA_b1'))
        featcat = _relu(jnp.dot(h, p('featA_W2'), preferred_element_type=jnp.float32) + p('featA_b2'))

        # ---- fused z heads -> zstat = [z1_mean | z2_mean | z1_lnvar | z2_lnvar] ----
        hz = _relu(jnp.dot(featcat, p('z_W1'), preferred_element_type=jnp.float32) + p('z_b1'))
        zstat = jnp.dot(hz, p('z_W2'), preferred_element_type=jnp.float32) + p('z_b2')

        # ---- unmixer residual (uses z means only; lnvar rows of unmix_W1z are zero) ----
        hu = _relu(jnp.dot(x, p('unmix_W1x'), preferred_element_type=jnp.float32)
                   + jnp.dot(zstat, p('unmix_W1z'), preferred_element_type=jnp.float32)
                   + p('unmix_b1'))
        unmixed = x + jnp.dot(hu, p('unmix_W2'), preferred_element_type=jnp.float32) + p('unmix_b2')

        # ---- phy feature + fused xi heads ----
        hp = _relu(jnp.dot(unmixed, p('featp_W1'), preferred_element_type=jnp.float32) + p('featp_b1'))
        feat_phy = _relu(jnp.dot(hp, p('featp_W2'), preferred_element_type=jnp.float32) + p('featp_b2'))
        hx = _relu(jnp.dot(feat_phy, p('xi_W1'), preferred_element_type=jnp.float32) + p('xi_b1'))
        xi_pair = jnp.dot(hx, p('xi_W2'), preferred_element_type=jnp.float32) + p('xi_b2')
        xi_mean = _softplus(xi_pair[:, 0:1])
        xi_lnvar = xi_pair[:, 1:2]

        # ---- reparameterized draw ----
        z_mean = zstat[:, 0:dz]
        z_lnvar = zstat[:, dz:2 * dz]
        z_aux = z_mean + jnp.exp(0.5 * z_lnvar) * eps_z       # [z_aux1 | z_aux2]
        xi = xi_mean + jnp.exp(0.5 * xi_lnvar) * eps_xi
        xi = jnp.clip(xi, xi_feasible_range[0], xi_feasible_range[1])

        # ---- decode: explicit Euler, fully unrolled; invariant matmul hoisted out ----
        h_base = jnp.dot(z_aux, p('aux1_W1z'), preferred_element_type=jnp.float32) + p('aux1_b1')
        w1y = p('aux1_W1y')        # (1, hid)
        w2row = p('aux1_W2row')    # (1, hid)
        b2 = p('aux1_b2')          # (1, 1)

        iota = lax.broadcasted_iota(jnp.int32, (1, dim_t), 1)   # hoisted out of the loop
        y = x[:, 0:1]
        v = jnp.zeros_like(y)
        y_seq = jnp.zeros((n, dim_t), jnp.float32)
        for k in range(len_intg):                               # static unroll (intg_lev == 1)
            y_seq = y_seq + y * (iota == k).astype(jnp.float32)
            if k + 1 < len_intg:                                # final update is discarded anyway
                h1 = _relu(h_base + y * w1y)
                # N=1 "matmul" as VPU multiply + XLU lane reduction (no MXU on the serial chain)
                aux = jnp.sum(h1 * w2row, axis=-1, keepdims=True) + b2
                y, v = y + dt_intg * v, v + dt_intg * (-xi * v + aux)

        # ---- residual head (res_W2/res_b2 pre-sliced to dim_t on the host) ----
        hr = _relu(xi * p('res_W1xi')
                   + jnp.dot(z_aux, p('res_W1z'), preferred_element_type=jnp.float32)
                   + p('res_b1'))
        residual = jnp.dot(hr, p('res_W2'), preferred_element_type=jnp.float32) + p('res_b2')
        x_mean = y_seq + residual

        # ---- single lane-dense (n, 128) output block: one write-back DMA ----
        out_ref[...] = jnp.zeros(out_ref.shape, out_ref.dtype)
        out_ref[:, 0:1] = xi_mean
        out_ref[:, 1:2] = xi_lnvar
        out_ref[:, 2:2 + 2 * dz] = zstat
        out_ref[:, 2 + 2 * dz:2 + 2 * dz + dim_t] = x_mean

    return kernel


# ----------------------------- wrapper -----------------------------
def vae_forward_pallas(x, P, eps_xi, eps_z1, eps_z2, cfg):
    n, dim_t = x.shape
    dz1, dz2 = cfg['dim_z_aux1'], cfg['dim_z_aux2']
    dz = dz1 + dz2
    assert 2 + 2 * dz + dim_t <= LANES

    slab, offsets = pack_params(P, cfg)

    # one packed data operand: [x | eps_xi | eps_z1 | eps_z2 | pad]
    data_w = dim_t + 1 + dz
    data_cols = 32 if data_w <= 32 else data_w
    data = jnp.zeros((n, data_cols), jnp.float32)
    data = data.at[:, 0:dim_t].set(x)
    data = data.at[:, dim_t:dim_t + 1].set(eps_xi)
    data = data.at[:, dim_t + 1:dim_t + 1 + dz1].set(eps_z1)
    data = data.at[:, dim_t + 1 + dz1:dim_t + 1 + dz].set(eps_z2)

    # Batch is tiny, so grid=(1,) with whole-array blocks; everything lives in VMEM.
    # (For realistic batch sizes one would grid over sublane-aligned batch blocks with
    #  dimension_semantics=('parallel',) so the two v7x TensorCores split the batch.)
    fn = pl.pallas_call(
        _make_kernel(cfg, offsets),
        out_shape=jax.ShapeDtypeStruct((n, LANES), jnp.float32),
        grid_spec=pltpu.PrefetchScalarGridSpec(
            num_scalar_prefetch=0,
            grid=(1,),
            in_specs=[pl.BlockSpec(data.shape, lambda i: (0, 0)),
                      pl.BlockSpec(slab.shape, lambda i: (0, 0))],
            out_specs=pl.BlockSpec((n, LANES), lambda i: (0, 0)),
        ),
        compiler_params=pltpu.CompilerParams(dimension_semantics=("arbitrary",)),
    )
    out = fn(data, slab)

    # unpack the lane-dense output block
    xi_mean = out[:, 0:1]
    xi_lnvar = out[:, 1:2]
    z1_mean = out[:, 2:2 + dz1]
    z2_mean = out[:, 2 + dz1:2 + dz]
    z1_lnvar = out[:, 2 + dz:2 + dz + dz1]
    z2_lnvar = out[:, 2 + dz + dz1:2 + 2 * dz]
    x_mean = out[:, 2 + 2 * dz:2 + 2 * dz + dim_t]

    x_lnvar = jnp.ones((1,), jnp.float32) * cfg['x_lnvar']   # dec.param_x_lnvar buffer
    return (xi_mean, xi_lnvar, z1_mean, z1_lnvar, z2_mean, z2_lnvar, x_mean), x_lnvar


# ----------------------------- main -----------------------------
if __name__ == "__main__":
    key = jax.random.PRNGKey(0)
    kx, kp, ke1, ke2, ke3 = jax.random.split(key, 5)

    n = 8
    x = jax.random.normal(kx, (n, CFG['dim_t']), jnp.float32)
    params = init_params(kp, CFG)
    # deterministic "draw_normal" noise (forward default hard_z=False)
    eps_xi = jax.random.normal(ke1, (n, 1), jnp.float32)
    eps_z1 = jax.random.normal(ke2, (n, CFG['dim_z_aux1']), jnp.float32)
    eps_z2 = jax.random.normal(ke3, (n, CFG['dim_z_aux2']), jnp.float32)

    outs, x_lnvar = vae_forward_pallas(x, params, eps_xi, eps_z1, eps_z2, CFG)
    outs = jax.block_until_ready(outs)

    xi_mean, xi_lnvar, z1_mean, z1_lnvar, z2_mean, z2_lnvar, x_mean = outs
    xi_stat = {'mean': xi_mean, 'lnvar': xi_lnvar}
    z_aux1_stat = {'mean': z1_mean, 'lnvar': z1_lnvar}
    z_aux2_stat = {'mean': z2_mean, 'lnvar': z2_lnvar}

    # plain-JAX (unfused) reference for a sanity check.
    # Tolerance: f32 dots on the TPU MXU use bf16-multiply passes under default
    # precision in both XLA and Mosaic, so ~1e-3-scale agreement is the correct
    # expectation; 5e-3 is 10x tighter than the previous 5e-2 check.
    ref = _vae_forward_math(x, params, eps_xi, eps_z1, eps_z2, CFG)
    for got, exp in zip(outs, ref):
        assert got.shape == exp.shape
        assert bool(jnp.all(jnp.isfinite(got)))
        assert bool(jnp.allclose(got, exp, atol=5e-3, rtol=5e-3))

    print("KERNEL_OK")
</pallas_src>

<mosaic_0001>
module attributes {stable_mosaic.version = 11 : i64} {
  func.func @kernel(%arg0: i32, %arg1: memref<8x32xf32, #tpu.memory_space<vmem>>, %arg2: memref<664x128xf32, #tpu.memory_space<vmem>>, %arg3: memref<8x128xf32, #tpu.memory_space<vmem>>) attributes {dimension_semantics = [#tpu.dimension_semantics<arbitrary>], iteration_bounds = array<i64: 1>, scalar_prefetch = 0 : i64, scratch_operands = 0 : i64, tpu.core_type = #tpu.core_type<tc>, window_params = [{pipeline_mode = #tpu.pipeline_mode<synchronous>, transform_indices = @transform_0, window_bounds = array<i64: 8, 32>}, {pipeline_mode = #tpu.pipeline_mode<synchronous>, transform_indices = @transform_1, window_bounds = array<i64: 664, 128>}, {pipeline_mode = #tpu.pipeline_mode<synchronous>, transform_indices = @transform_2, window_bounds = array<i64: 8, 128>}]} {
    %c0 = arith.constant 0 : index
    %c0_0 = arith.constant 0 : index
    %0 = vector.load %arg1[%c0, %c0_0] : memref<8x32xf32, #tpu.memory_space<vmem>>, vector<8x16xf32>
    %c0_1 = arith.constant 0 : index
    %c16 = arith.constant 16 : index
    %1 = vector.load %arg1[%c0_1, %c16] : memref<8x32xf32, #tpu.memory_space<vmem>>, vector<8x1xf32>
    %c0_2 = arith.constant 0 : index
    %c17 = arith.constant 17 : index
    %2 = vector.load %arg1[%c0_2, %c17] : memref<8x32xf32, #tpu.memory_space<vmem>>, vector<8x8xf32>
    %c0_3 = arith.constant 0 : index
    %c0_4 = arith.constant 0 : index
    %3 = vector.load %arg2[%c0_3, %c0_4] : memref<664x128xf32, #tpu.memory_space<vmem>>, vector<16x64xf32>
    %cst = arith.constant dense<0.000000e+00> : vector<8x64xf32>
    %4 = tpu.matmul %0, %3, %cst {dimension_numbers = #tpu.dot_dimension_numbers<[1], [0], [0], [1], [0, 0, 1, 1], [], []>} : vector<8x16xf32>, vector<16x64xf32>, vector<8x64xf32> -> vector<8x64xf32>
    %c16_5 = arith.constant 16 : index
    %c0_6 = arith.constant 0 : index
    %5 = vector.load %arg2[%c16_5, %c0_6] : memref<664x128xf32, #tpu.memory_space<vmem>>, vector<1x64xf32>
    %6 = vector.broadcast %5 : vector<1x64xf32> to vector<8x64xf32>
    %7 = arith.addf %4, %6 : vector<8x64xf32>
    %cst_7 = arith.constant 0.000000e+00 : f32
    %8 = vector.broadcast %cst_7 : f32 to vector<8x64xf32>
    %9 = arith.maximumf %7, %8 : vector<8x64xf32>
    %c24 = arith.constant 24 : index
    %c0_8 = arith.constant 0 : index
    %10 = vector.load %arg2[%c24, %c0_8] : memref<664x128xf32, #tpu.memory_space<vmem>>, vector<64x64xf32>
    %cst_9 = arith.constant dense<0.000000e+00> : vector<8x64xf32>
    %11 = tpu.matmul %9, %10, %cst_9 {dimension_numbers = #tpu.dot_dimension_numbers<[1], [0], [0], [1], [0, 0, 1, 1], [], []>} : vector<8x64xf32>, vector<64x64xf32>, vector<8x64xf32> -> vector<8x64xf32>
    %c88 = arith.constant 88 : index
    %c0_10 = arith.constant 0 : index
    %12 = vector.load %arg2[%c88, %c0_10] : memref<664x128xf32, #tpu.memory_space<vmem>>, vector<1x64xf32>
    %13 = vector.broadcast %12 : vector<1x64xf32> to vector<8x64xf32>
    %14 = arith.addf %11, %13 : vector<8x64xf32>
    %cst_11 = arith.constant 0.000000e+00 : f32
    %15 = vector.broadcast %cst_11 : f32 to vector<8x64xf32>
    %16 = arith.maximumf %14, %15 : vector<8x64xf32>
    %c96 = arith.constant 96 : index
    %c0_12 = arith.constant 0 : index
    %17 = vector.load %arg2[%c96, %c0_12] : memref<664x128xf32, #tpu.memory_space<vmem>>, vector<64x128xf32>
    %cst_13 = arith.constant dense<0.000000e+00> : vector<8x128xf32>
    %18 = tpu.matmul %16, %17, %cst_13 {dimension_numbers = #tpu.dot_dimension_numbers<[1], [0], [0], [1], [0, 0, 1, 1], [], []>} : vector<8x64xf32>, vector<64x128xf32>, vector<8x128xf32> -> vector<8x128xf32>
    %c160 = arith.constant 160 : index
    %c0_14 = arith.constant 0 : index
    %19 = vector.load %arg2[%c160, %c0_14] : memref<664x128xf32, #tpu.memory_space<vmem>>, vector<1x128xf32>
    %20 = vector.broadcast %19 : vector<1x128xf32> to vector<8x128xf32>
    %21 = arith.addf %18, %20 : vector<8x128xf32>
    %cst_15 = arith.constant 0.000000e+00 : f32
    %22 = vector.broadcast %cst_15 : f32 to vector<8x128xf32>
    %23 = arith.maximumf %21, %22 : vector<8x128xf32>
    %c168 = arith.constant 168 : index
    %c0_16 = arith.constant 0 : index
    %24 = vector.load %arg2[%c168, %c0_16] : memref<664x128xf32, #tpu.memory_space<vmem>>, vector<128x16xf32>
    %cst_17 = arith.constant dense<0.000000e+00> : vector<8x16xf32>
    %25 = tpu.matmul %23, %24, %cst_17 {dimension_numbers = #tpu.dot_dimension_numbers<[1], [0], [0], [1], [0, 0, 1, 1], [], []>} : vector<8x128xf32>, vector<128x16xf32>, vector<8x16xf32> -> vector<8x16xf32>
    %c296 = arith.constant 296 : index
    %c0_18 = arith.constant 0 : index
    %26 = vector.load %arg2[%c296, %c0_18] : memref<664x128xf32, #tpu.memory_space<vmem>>, vector<1x16xf32>
    %27 = vector.broadcast %26 : vector<1x16xf32> to vector<8x16xf32>
    %28 = arith.addf %25, %27 : vector<8x16xf32>
    %c304 = arith.constant 304 : index
    %c0_19 = arith.constant 0 : index
    %29 = vector.load %arg2[%c304, %c0_19] : memref<664x128xf32, #tpu.memory_space<vmem>>, vector<16x32xf32>
    %cst_20 = arith.constant dense<0.000000e+00> : vector<8x32xf32>
    %30 = tpu.matmul %0, %29, %cst_20 {dimension_numbers = #tpu.dot_dimension_numbers<[1], [0], [0], [1], [0, 0, 1, 1], [], []>} : vector<8x16xf32>, vector<16x32xf32>, vector<8x32xf32> -> vector<8x32xf32>
    %c320 = arith.constant 320 : index
    %c0_21 = arith.constant 0 : index
    %31 = vector.load %arg2[%c320, %c0_21] : memref<664x128xf32, #tpu.memory_space<vmem>>, vector<16x32xf32>
    %cst_22 = arith.constant dense<0.000000e+00> : vector<8x32xf32>
    %32 = tpu.matmul %28, %31, %cst_22 {dimension_numbers = #tpu.dot_dimension_numbers<[1], [0], [0], [1], [0, 0, 1, 1], [], []>} : vector<8x16xf32>, vector<16x32xf32>, vector<8x32xf32> -> vector<8x32xf32>
    %33 = arith.addf %30, %32 : vector<8x32xf32>
    %c336 = arith.constant 336 : index
    %c0_23 = arith.constant 0 : index
    %34 = vector.load %arg2[%c336, %c0_23] : memref<664x128xf32, #tpu.memory_space<vmem>>, vector<1x32xf32>
    %35 = vector.broadcast %34 : vector<1x32xf32> to vector<8x32xf32>
    %36 = arith.addf %33, %35 : vector<8x32xf32>
    %cst_24 = arith.constant 0.000000e+00 : f32
    %37 = vector.broadcast %cst_24 : f32 to vector<8x32xf32>
    %38 = arith.maximumf %36, %37 : vector<8x32xf32>
    %c344 = arith.constant 344 : index
    %c0_25 = arith.constant 0 : index
    %39 = vector.load %arg2[%c344, %c0_25] : memref<664x128xf32, #tpu.memory_space<vmem>>, vector<32x16xf32>
    %cst_26 = arith.constant dense<0.000000e+00> : vector<8x16xf32>
    %40 = tpu.matmul %38, %39, %cst_26 {dimension_numbers = #tpu.dot_dimension_numbers<[1], [0], [0], [1], [0, 0, 1, 1], [], []>} : vector<8x32xf32>, vector<32x16xf32>, vector<8x16xf32> -> vector<8x16xf32>
    %41 = arith.addf %0, %40 : vector<8x16xf32>
    %c376 = arith.constant 376 : index
    %c0_27 = arith.constant 0 : index
    %42 = vector.load %arg2[%c376, %c0_27] : memref<664x128xf32, #tpu.memory_space<vmem>>, vector<1x16xf32>
    %43 = vector.broadcast %42 : vector<1x16xf32> to vector<8x16xf32>
    %44 = arith.addf %41, %43 : vector<8x16xf32>
    %c384 = arith.constant 384 : index
    %c0_28 = arith.constant 0 : index
    %45 = vector.load %arg2[%c384, %c0_28] : memref<664x128xf32, #tpu.memory_space<vmem>>, vector<16x32xf32>
    %cst_29 = arith.constant dense<0.000000e+00> : vector<8x32xf32>
    %46 = tpu.matmul %44, %45, %cst_29 {dimension_numbers = #tpu.dot_dimension_numbers<[1], [0], [0], [1], [0, 0, 1, 1], [], []>} : vector<8x16xf32>, vector<16x32xf32>, vector<8x32xf32> -> vector<8x32xf32>
    %c400 = arith.constant 400 : index
    %c0_30 = arith.constant 0 : index
    %47 = vector.load %arg2[%c400, %c0_30] : memref<664x128xf32, #tpu.memory_space<vmem>>, vector<1x32xf32>
    %48 = vector.broadcast %47 : vector<1x32xf32> to vector<8x32xf32>
    %49 = arith.addf %46, %48 : vector<8x32xf32>
    %cst_31 = arith.constant 0.000000e+00 : f32
    %50 = vector.broadcast %cst_31 : f32 to vector<8x32xf32>
    %51 = arith.maximumf %49, %50 : vector<8x32xf32>
    %c408 = arith.constant 408 : index
    %c0_32 = arith.constant 0 : index
    %52 = vector.load %arg2[%c408, %c0_32] : memref<664x128xf32, #tpu.memory_space<vmem>>, vector<32x32xf32>
    %cst_33 = arith.constant dense<0.000000e+00> : vector<8x32xf32>
    %53 = tpu.matmul %51, %52, %cst_33 {dimension_numbers = #tpu.dot_dimension_numbers<[1], [0], [0], [1], [0, 0, 1, 1], [], []>} : vector<8x32xf32>, vector<32x32xf32>, vector<8x32xf32> -> vector<8x32xf32>
    %c440 = arith.constant 440 : index
    %c0_34 = arith.constant 0 : index
    %54 = vector.load %arg2[%c440, %c0_34] : memref<664x128xf32, #tpu.memory_space<vmem>>, vector<1x32xf32>
    %55 = vector.broadcast %54 : vector<1x32xf32> to vector<8x32xf32>
    %56 = arith.addf %53, %55 : vector<8x32xf32>
    %cst_35 = arith.constant 0.000000e+00 : f32
    %57 = vector.broadcast %cst_35 : f32 to vector<8x32xf32>
    %58 = arith.maximumf %56, %57 : vector<8x32xf32>
    %c448 = arith.constant 448 : index
    %c0_36 = arith.constant 0 : index
    %59 = vector.load %arg2[%c448, %c0_36] : memref<664x128xf32, #tpu.memory_space<vmem>>, vector<32x64xf32>
    %cst_37 = arith.constant dense<0.000000e+00> : vector<8x64xf32>
    %60 = tpu.matmul %58, %59, %cst_37 {dimension_numbers = #tpu.dot_dimension_numbers<[1], [0], [0], [1], [0, 0, 1, 1], [], []>} : vector<8x32xf32>, vector<32x64xf32>, vector<8x64xf32> -> vector<8x64xf32>
    %c480 = arith.constant 480 : index
    %c0_38 = arith.constant 0 : index
    %61 = vector.load %arg2[%c480, %c0_38] : memref<664x128xf32, #tpu.memory_space<vmem>>, vector<1x64xf32>
    %62 = vector.broadcast %61 : vector<1x64xf32> to vector<8x64xf32>
    %63 = arith.addf %60, %62 : vector<8x64xf32>
    %cst_39 = arith.constant 0.000000e+00 : f32
    %64 = vector.broadcast %cst_39 : f32 to vector<8x64xf32>
    %65 = arith.maximumf %63, %64 : vector<8x64xf32>
    %c488 = arith.constant 488 : index
    %c0_40 = arith.constant 0 : index
    %66 = vector.load %arg2[%c488, %c0_40] : memref<664x128xf32, #tpu.memory_space<vmem>>, vector<64x2xf32>
    %cst_41 = arith.constant dense<0.000000e+00> : vector<8x2xf32>
    %67 = tpu.matmul %65, %66, %cst_41 {dimension_numbers = #tpu.dot_dimension_numbers<[1], [0], [0], [1], [0, 0, 1, 1], [], []>} : vector<8x64xf32>, vector<64x2xf32>, vector<8x2xf32> -> vector<8x2xf32>
    %c552 = arith.constant 552 : index
    %c0_42 = arith.constant 0 : index
    %68 = vector.load %arg2[%c552, %c0_42] : memref<664x128xf32, #tpu.memory_space<vmem>>, vector<1x2xf32>
    %69 = vector.broadcast %68 : vector<1x2xf32> to vector<8x2xf32>
    %70 = arith.addf %67, %69 : vector<8x2xf32>
    %71 = vector.extract_strided_slice %70 {offsets = [0, 0], sizes = [8, 1], strides = [1, 1]} : vector<8x2xf32> to vector<8x1xf32>
    %cst_43 = arith.constant 0.000000e+00 : f32
    %72 = vector.broadcast %cst_43 : f32 to vector<8x1xf32>
    %73 = arith.maximumf %71, %72 : vector<8x1xf32>
    %74 = math.absf %71 : vector<8x1xf32>
    %cst_44 = arith.constant 0.000000e+00 : f32
    %75 = vector.broadcast %cst_44 : f32 to vector<8x1xf32>
    %76 = arith.subf %75, %74 : vector<8x1xf32>
    %77 = math.exp %76 : vector<8x1xf32>
    %cst_45 = arith.constant 1.000000e+00 : f32
    %78 = vector.broadcast %cst_45 : f32 to vector<8x1xf32>
    %79 = arith.addf %78, %77 : vector<8x1xf32>
    %80 = math.log %79 : vector<8x1xf32>
    %81 = arith.addf %73, %80 : vector<8x1xf32>
    %82 = vector.extract_strided_slice %70 {offsets = [0, 1], sizes = [8, 1], strides = [1, 1]} : vector<8x2xf32> to vector<8x1xf32>
    %83 = vector.extract_strided_slice %28 {offsets = [0, 0], sizes = [8, 8], strides = [1, 1]} : vector<8x16xf32> to vector<8x8xf32>
    %84 = vector.extract_strided_slice %28 {offsets = [0, 8], sizes = [8, 8], strides = [1, 1]} : vector<8x16xf32> to vector<8x8xf32>
    %cst_46 = arith.constant 5.000000e-01 : f32
    %85 = vector.broadcast %cst_46 : f32 to vector<8x8xf32>
    %86 = arith.mulf %85, %84 : vector<8x8xf32>
    %87 = math.exp %86 : vector<8x8xf32>
    %88 = arith.mulf %87, %2 : vector<8x8xf32>
    %89 = arith.addf %83, %88 : vector<8x8xf32>
    %cst_47 = arith.constant 5.000000e-01 : f32
    %90 = vector.broadcast %cst_47 : f32 to vector<8x1xf32>
    %91 = arith.mulf %90, %82 : vector<8x1xf32>
    %92 = math.exp %91 : vector<8x1xf32>
    %93 = arith.mulf %92, %1 : vector<8x1xf32>
    %94 = arith.addf %81, %93 : vector<8x1xf32>
    %cst_48 = arith.constant 0.000000e+00 : f32
    %cst_49 = arith.constant 1.000000e+00 : f32
    %95 = vector.broadcast %cst_48 : f32 to vector<8x1xf32>
    %96 = arith.maximumf %95, %94 : vector<8x1xf32>
    %97 = vector.broadcast %cst_49 : f32 to vector<8x1xf32>
    %98 = arith.minimumf %97, %96 : vector<8x1xf32>
    %c560 = arith.constant 560 : index
    %c0_50 = arith.constant 0 : index
    %99 = vector.load %arg2[%c560, %c0_50] : memref<664x128xf32, #tpu.memory_space<vmem>>, vector<8x32xf32>
    %cst_51 = arith.constant dense<0.000000e+00> : vector<8x32xf32>
    %100 = tpu.matmul %89, %99, %cst_51 {dimension_numbers = #tpu.dot_dimension_numbers<[1], [0], [0], [1], [0, 0, 1, 1], [], []>} : vector<8x8xf32>, vector<8x32xf32>, vector<8x32xf32> -> vector<8x32xf32>
    %c576 = arith.constant 576 : index
    %c0_52 = arith.constant 0 : index
    %101 = vector.load %arg2[%c576, %c0_52] : memref<664x128xf32, #tpu.memory_space<vmem>>, vector<1x32xf32>
    %102 = vector.broadcast %101 : vector<1x32xf32> to vector<8x32xf32>
    %103 = arith.addf %100, %102 : vector<8x32xf32>
    %c568 = arith.constant 568 : index
    %c0_53 = arith.constant 0 : index
    %104 = vector.load %arg2[%c568, %c0_53] : memref<664x128xf32, #tpu.memory_space<vmem>>, vector<1x32xf32>
    %c584 = arith.constant 584 : index
    %c0_54 = arith.constant 0 : index
    %105 = vector.load %arg2[%c584, %c0_54] : memref<664x128xf32, #tpu.memory_space<vmem>>, vector<1x32xf32>
    %c592 = arith.constant 592 : index
    %c0_55 = arith.constant 0 : index
    %106 = vector.load %arg2[%c592, %c0_55] : memref<664x128xf32, #tpu.memory_space<vmem>>, vector<1x1xf32>
    %107 = tpu.iota {dimensions = array<i32: 1>} : vector<1x16xi32>
    %108 = vector.extract_strided_slice %0 {offsets = [0, 0], sizes = [8, 1], strides = [1, 1]} : vector<8x16xf32> to vector<8x1xf32>
    %cst_56 = arith.constant 0.000000e+00 : f32
    %109 = vector.broadcast %cst_56 : f32 to vector<8x1xf32>
    %cst_57 = arith.constant 0.000000e+00 : f32
    %110 = vector.broadcast %cst_57 : f32 to vector<8x16xf32>
    %c0_i32 = arith.constant 0 : i32
    %111 = vector.broadcast %c0_i32 : i32 to vector<1x16xi32>
    %112 = arith.cmpi eq, %107, %111 : vector<1x16xi32>
    %113 = arith.extui %112 : vector<1x16xi1> to vector<1x16xi32>
    %114 = arith.sitofp %113 : vector<1x16xi32> to vector<1x16xf32>
    %115 = vector.broadcast %108 : vector<8x1xf32> to vector<8x16xf32>
    %116 = vector.broadcast %114 : vector<1x16xf32> to vector<8x16xf32>
    %117 = arith.mulf %115, %116 : vector<8x16xf32>
    %118 = arith.addf %110, %117 : vector<8x16xf32>
    %119 = vector.broadcast %108 : vector<8x1xf32> to vector<8x32xf32>
    %120 = vector.broadcast %104 : vector<1x32xf32> to vector<8x32xf32>
    %121 = arith.mulf %119, %120 : vector<8x32xf32>
    %122 = arith.addf %103, %121 : vector<8x32xf32>
    %cst_58 = arith.constant 0.000000e+00 : f32
    %123 = vector.broadcast %cst_58 : f32 to vector<8x32xf32>
    %124 = arith.maximumf %122, %123 : vector<8x32xf32>
    %125 = vector.broadcast %105 : vector<1x32xf32> to vector<8x32xf32>
    %126 = arith.mulf %124, %125 : vector<8x32xf32>
    %cst_59 = arith.constant dense<0.000000e+00> : vector<8xf32>
    %127 = vector.multi_reduction <add>, %126, %cst_59 [1] : vector<8x32xf32> to vector<8xf32>
    %128 = vector.shape_cast %127 : vector<8xf32> to vector<8x1xf32>
    %129 = vector.broadcast %106 : vector<1x1xf32> to vector<8x1xf32>
    %130 = arith.addf %128, %129 : vector<8x1xf32>
    %cst_60 = arith.constant 1.000000e-01 : f32
    %131 = vector.broadcast %cst_60 : f32 to vector<8x1xf32>
    %132 = arith.mulf %131, %109 : vector<8x1xf32>
    %133 = arith.addf %108, %132 : vector<8x1xf32>
    %cst_61 = arith.constant 0.000000e+00 : f32
    %134 = vector.broadcast %cst_61 : f32 to vector<8x1xf32>
    %135 = arith.subf %134, %98 : vector<8x1xf32>
    %136 = arith.mulf %135, %109 : vector<8x1xf32>
    %137 = arith.addf %136, %130 : vector<8x1xf32>
    %cst_62 = arith.constant 1.000000e-01 : f32
    %138 = vector.broadcast %cst_62 : f32 to vector<8x1xf32>
    %139 = arith.mulf %138, %137 : vector<8x1xf32>
    %140 = arith.addf %109, %139 : vector<8x1xf32>
    %c1_i32 = arith.constant 1 : i32
    %141 = vector.broadcast %c1_i32 : i32 to vector<1x16xi32>
    %142 = arith.cmpi eq, %107, %141 : vector<1x16xi32>
    %143 = arith.extui %142 : vector<1x16xi1> to vector<1x16xi32>
    %144 = arith.sitofp %143 : vector<1x16xi32> to vector<1x16xf32>
    %145 = vector.broadcast %133 : vector<8x1xf32> to vector<8x16xf32>
    %146 = vector.broadcast %144 : vector<1x16xf32> to vector<8x16xf32>
    %147 = arith.mulf %145, %146 : vector<8x16xf32>
    %148 = arith.addf %118, %147 : vector<8x16xf32>
    %149 = vector.broadcast %133 : vector<8x1xf32> to vector<8x32xf32>
    %150 = vector.broadcast %104 : vector<1x32xf32> to vector<8x32xf32>
    %151 = arith.mulf %149, %150 : vector<8x32xf32>
    %152 = arith.addf %103, %151 : vector<8x32xf32>
    %cst_63 = arith.constant 0.000000e+00 : f32
    %153 = vector.broadcast %cst_63 : f32 to vector<8x32xf32>
    %154 = arith.maximumf %152, %153 : vector<8x32xf32>
    %155 = vector.broadcast %105 : vector<1x32xf32> to vector<8x32xf32>
    %156 = arith.mulf %154, %155 : vector<8x32xf32>
    %cst_64 = arith.constant dense<0.000000e+00> : vector<8xf32>
    %157 = vector.multi_reduction <add>, %156, %cst_64 [1] : vector<8x32xf32> to vector<8xf32>
    %158 = vector.shape_cast %157 : vector<8xf32> to vector<8x1xf32>
    %159 = vector.broadcast %106 : vector<1x1xf32> to vector<8x1xf32>
    %160 = arith.addf %158, %159 : vector<8x1xf32>
    %cst_65 = arith.constant 1.000000e-01 : f32
    %161 = vector.broadcast %cst_65 : f32 to vector<8x1xf32>
    %162 = arith.mulf %161, %140 : vector<8x1xf32>
    %163 = arith.addf %133, %162 : vector<8x1xf32>
    %cst_66 = arith.constant 0.000000e+00 : f32
    %164 = vector.broadcast %cst_66 : f32 to vector<8x1xf32>
    %165 = arith.subf %164, %98 : vector<8x1xf32>
    %166 = arith.mulf %165, %140 : vector<8x1xf32>
    %167 = arith.addf %166, %160 : vector<8x1xf32>
    %cst_67 = arith.constant 1.000000e-01 : f32
    %168 = vector.broadcast %cst_67 : f32 to vector<8x1xf32>
    %169 = arith.mulf %168, %167 : vector<8x1xf32>
    %170 = arith.addf %140, %169 : vector<8x1xf32>
    %c2_i32 = arith.constant 2 : i32
    %171 = vector.broadcast %c2_i32 : i32 to vector<1x16xi32>
    %172 = arith.cmpi eq, %107, %171 : vector<1x16xi32>
    %173 = arith.extui %172 : vector<1x16xi1> to vector<1x16xi32>
    %174 = arith.sitofp %173 : vector<1x16xi32> to vector<1x16xf32>
    %175 = vector.broadcast %163 : vector<8x1xf32> to vector<8x16xf32>
    %176 = vector.broadcast %174 : vector<1x16xf32> to vector<8x16xf32>
    %177 = arith.mulf %175, %176 : vector<8x16xf32>
    %178 = arith.addf %148, %177 : vector<8x16xf32>
    %179 = vector.broadcast %163 : vector<8x1xf32> to vector<8x32xf32>
    %180 = vector.broadcast %104 : vector<1x32xf32> to vector<8x32xf32>
    %181 = arith.mulf %179, %180 : vector<8x32xf32>
    %182 = arith.addf %103, %181 : vector<8x32xf32>
    %cst_68 = arith.constant 0.000000e+00 : f32
    %183 = vector.broadcast %cst_68 : f32 to vector<8x32xf32>
    %184 = arith.maximumf %182, %183 : vector<8x32xf32>
    %185 = vector.broadcast %105 : vector<1x32xf32> to vector<8x32xf32>
    %186 = arith.mulf %184, %185 : vector<8x32xf32>
    %cst_69 = arith.constant dense<0.000000e+00> : vector<8xf32>
    %187 = vector.multi_reduction <add>, %186, %cst_69 [1] : vector<8x32xf32> to vector<8xf32>
    %188 = vector.shape_cast %187 : vector<8xf32> to vector<8x1xf32>
    %189 = vector.broadcast %106 : vector<1x1xf32> to vector<8x1xf32>
    %190 = arith.addf %188, %189 : vector<8x1xf32>
    %cst_70 = arith.constant 1.000000e-01 : f32
    %191 = vector.broadcast %cst_70 : f32 to vector<8x1xf32>
    %192 = arith.mulf %191, %170 : vector<8x1xf32>
    %193 = arith.addf %163, %192 : vector<8x1xf32>
    %cst_71 = arith.constant 0.000000e+00 : f32
    %194 = vector.broadcast %cst_71 : f32 to vector<8x1xf32>
    %195 = arith.subf %194, %98 : vector<8x1xf32>
    %196 = arith.mulf %195, %170 : vector<8x1xf32>
    %197 = arith.addf %196, %190 : vector<8x1xf32>
    %cst_72 = arith.constant 1.000000e-01 : f32
    %198 = vector.broadcast %cst_72 : f32 to vector<8x1xf32>
    %199 = arith.mulf %198, %197 : vector<8x1xf32>
    %200 = arith.addf %170, %199 : vector<8x1xf32>
    %c3_i32 = arith.constant 3 : i32
    %201 = vector.broadcast %c3_i32 : i32 to vector<1x16xi32>
    %202 = arith.cmpi eq, %107, %201 : vector<1x16xi32>
    %203 = arith.extui %202 : vector<1x16xi1> to vector<1x16xi32>
    %204 = arith.sitofp %203 : vector<1x16xi32> to vector<1x16xf32>
    %205 = vector.broadcast %193 : vector<8x1xf32> to vector<8x16xf32>
    %206 = vector.broadcast %204 : vector<1x16xf32> to vector<8x16xf32>
    %207 = arith.mulf %205, %206 : vector<8x16xf32>
    %208 = arith.addf %178, %207 : vector<8x16xf32>
    %209 = vector.broadcast %193 : vector<8x1xf32> to vector<8x32xf32>
    %210 = vector.broadcast %104 : vector<1x32xf32> to vector<8x32xf32>
    %211 = arith.mulf %209, %210 : vector<8x32xf32>
    %212 = arith.addf %103, %211 : vector<8x32xf32>
    %cst_73 = arith.constant 0.000000e+00 : f32
    %213 = vector.broadcast %cst_73 : f32 to vector<8x32xf32>
    %214 = arith.maximumf %212, %213 : vector<8x32xf32>
    %215 = vector.broadcast %105 : vector<1x32xf32> to vector<8x32xf32>
    %216 = arith.mulf %214, %215 : vector<8x32xf32>
    %cst_74 = arith.constant dense<0.000000e+00> : vector<8xf32>
    %217 = vector.multi_reduction <add>, %216, %cst_74 [1] : vector<8x32xf32> to vector<8xf32>
    %218 = vector.shape_cast %217 : vector<8xf32> to vector<8x1xf32>
    %219 = vector.broadcast %106 : vector<1x1xf32> to vector<8x1xf32>
    %220 = arith.addf %218, %219 : vector<8x1xf32>
    %cst_75 = arith.constant 1.000000e-01 : f32
    %221 = vector.broadcast %cst_75 : f32 to vector<8x1xf32>
    %222 = arith.mulf %221, %200 : vector<8x1xf32>
    %223 = arith.addf %193, %222 : vector<8x1xf32>
    %cst_76 = arith.constant 0.000000e+00 : f32
    %224 = vector.broadcast %cst_76 : f32 to vector<8x1xf32>
    %225 = arith.subf %224, %98 : vector<8x1xf32>
    %226 = arith.mulf %225, %200 : vector<8x1xf32>
    %227 = arith.addf %226, %220 : vector<8x1xf32>
    %cst_77 = arith.constant 1.000000e-01 : f32
    %228 = vector.broadcast %cst_77 : f32 to vector<8x1xf32>
    %229 = arith.mulf %228, %227 : vector<8x1xf32>
    %230 = arith.addf %200, %229 : vector<8x1xf32>
    %c4_i32 = arith.constant 4 : i32
    %231 = vector.broadcast %c4_i32 : i32 to vector<1x16xi32>
    %232 = arith.cmpi eq, %107, %231 : vector<1x16xi32>
    %233 = arith.extui %232 : vector<1x16xi1> to vector<1x16xi32>
    %234 = arith.sitofp %233 : vector<1x16xi32> to vector<1x16xf32>
    %235 = vector.broadcast %223 : vector<8x1xf32> to vector<8x16xf32>
    %236 = vector.broadcast %234 : vector<1x16xf32> to vector<8x16xf32>
    %237 = arith.mulf %235, %236 : vector<8x16xf32>
    %238 = arith.addf %208, %237 : vector<8x16xf32>
    %239 = vector.broadcast %223 : vector<8x1xf32> to vector<8x32xf32>
    %240 = vector.broadcast %104 : vector<1x32xf32> to vector<8x32xf32>
    %241 = arith.mulf %239, %240 : vector<8x32xf32>
    %242 = arith.addf %103, %241 : vector<8x32xf32>
    %cst_78 = arith.constant 0.000000e+00 : f32
    %243 = vector.broadcast %cst_78 : f32 to vector<8x32xf32>
    %244 = arith.maximumf %242, %243 : vector<8x32xf32>
    %245 = vector.broadcast %105 : vector<1x32xf32> to vector<8x32xf32>
    %246 = arith.mulf %244, %245 : vector<8x32xf32>
    %cst_79 = arith.constant dense<0.000000e+00> : vector<8xf32>
    %247 = vector.multi_reduction <add>, %246, %cst_79 [1] : vector<8x32xf32> to vector<8xf32>
    %248 = vector.shape_cast %247 : vector<8xf32> to vector<8x1xf32>
    %249 = vector.broadcast %106 : vector<1x1xf32> to vector<8x1xf32>
    %250 = arith.addf %248, %249 : vector<8x1xf32>
    %cst_80 = arith.constant 1.000000e-01 : f32
    %251 = vector.broadcast %cst_80 : f32 to vector<8x1xf32>
    %252 = arith.mulf %251, %230 : vector<8x1xf32>
    %253 = arith.addf %223, %252 : vector<8x1xf32>
    %cst_81 = arith.constant 0.000000e+00 : f32
    %254 = vector.broadcast %cst_81 : f32 to vector<8x1xf32>
    %255 = arith.subf %254, %98 : vector<8x1xf32>
    %256 = arith.mulf %255, %230 : vector<8x1xf32>
    %257 = arith.addf %256, %250 : vector<8x1xf32>
    %cst_82 = arith.constant 1.000000e-01 : f32
    %258 = vector.broadcast %cst_82 : f32 to vector<8x1xf32>
    %259 = arith.mulf %258, %257 : vector<8x1xf32>
    %260 = arith.addf %230, %259 : vector<8x1xf32>
    %c5_i32 = arith.constant 5 : i32
    %261 = vector.broadcast %c5_i32 : i32 to vector<1x16xi32>
    %262 = arith.cmpi eq, %107, %261 : vector<1x16xi32>
    %263 = arith.extui %262 : vector<1x16xi1> to vector<1x16xi32>
    %264 = arith.sitofp %263 : vector<1x16xi32> to vector<1x16xf32>
    %265 = vector.broadcast %253 : vector<8x1xf32> to vector<8x16xf32>
    %266 = vector.broadcast %264 : vector<1x16xf32> to vector<8x16xf32>
    %267 = arith.mulf %265, %266 : vector<8x16xf32>
    %268 = arith.addf %238, %267 : vector<8x16xf32>
    %269 = vector.broadcast %253 : vector<8x1xf32> to vector<8x32xf32>
    %270 = vector.broadcast %104 : vector<1x32xf32> to vector<8x32xf32>
    %271 = arith.mulf %269, %270 : vector<8x32xf32>
    %272 = arith.addf %103, %271 : vector<8x32xf32>
    %cst_83 = arith.constant 0.000000e+00 : f32
    %273 = vector.broadcast %cst_83 : f32 to vector<8x32xf32>
    %274 = arith.maximumf %272, %273 : vector<8x32xf32>
    %275 = vector.broadcast %105 : vector<1x32xf32> to vector<8x32xf32>
    %276 = arith.mulf %274, %275 : vector<8x32xf32>
    %cst_84 = arith.constant dense<0.000000e+00> : vector<8xf32>
    %277 = vector.multi_reduction <add>, %276, %cst_84 [1] : vector<8x32xf32> to vector<8xf32>
    %278 = vector.shape_cast %277 : vector<8xf32> to vector<8x1xf32>
    %279 = vector.broadcast %106 : vector<1x1xf32> to vector<8x1xf32>
    %280 = arith.addf %278, %279 : vector<8x1xf32>
    %cst_85 = arith.constant 1.000000e-01 : f32
    %281 = vector.broadcast %cst_85 : f32 to vector<8x1xf32>
    %282 = arith.mulf %281, %260 : vector<8x1xf32>
    %283 = arith.addf %253, %282 : vector<8x1xf32>
    %cst_86 = arith.constant 0.000000e+00 : f32
    %284 = vector.broadcast %cst_86 : f32 to vector<8x1xf32>
    %285 = arith.subf %284, %98 : vector<8x1xf32>
    %286 = arith.mulf %285, %260 : vector<8x1xf32>
    %287 = arith.addf %286, %280 : vector<8x1xf32>
    %cst_87 = arith.constant 1.000000e-01 : f32
    %288 = vector.broadcast %cst_87 : f32 to vector<8x1xf32>
    %289 = arith.mulf %288, %287 : vector<8x1xf32>
    %290 = arith.addf %260, %289 : vector<8x1xf32>
    %c6_i32 = arith.constant 6 : i32
    %291 = vector.broadcast %c6_i32 : i32 to vector<1x16xi32>
    %292 = arith.cmpi eq, %107, %291 : vector<1x16xi32>
    %293 = arith.extui %292 : vector<1x16xi1> to vector<1x16xi32>
    %294 = arith.sitofp %293 : vector<1x16xi32> to vector<1x16xf32>
    %295 = vector.broadcast %283 : vector<8x1xf32> to vector<8x16xf32>
    %296 = vector.broadcast %294 : vector<1x16xf32> to vector<8x16xf32>
    %297 = arith.mulf %295, %296 : vector<8x16xf32>
    %298 = arith.addf %268, %297 : vector<8x16xf32>
    %299 = vector.broadcast %283 : vector<8x1xf32> to vector<8x32xf32>
    %300 = vector.broadcast %104 : vector<1x32xf32> to vector<8x32xf32>
    %301 = arith.mulf %299, %300 : vector<8x32xf32>
    %302 = arith.addf %103, %301 : vector<8x32xf32>
    %cst_88 = arith.constant 0.000000e+00 : f32
    %303 = vector.broadcast %cst_88 : f32 to vector<8x32xf32>
    %304 = arith.maximumf %302, %303 : vector<8x32xf32>
    %305 = vector.broadcast %105 : vector<1x32xf32> to vector<8x32xf32>
    %306 = arith.mulf %304, %305 : vector<8x32xf32>
    %cst_89 = arith.constant dense<0.000000e+00> : vector<8xf32>
    %307 = vector.multi_reduction <add>, %306, %cst_89 [1] : vector<8x32xf32> to vector<8xf32>
    %308 = vector.shape_cast %307 : vector<8xf32> to vector<8x1xf32>
    %309 = vector.broadcast %106 : vector<1x1xf32> to vector<8x1xf32>
    %310 = arith.addf %308, %309 : vector<8x1xf32>
    %cst_90 = arith.constant 1.000000e-01 : f32
    %311 = vector.broadcast %cst_90 : f32 to vector<8x1xf32>
    %312 = arith.mulf %311, %290 : vector<8x1xf32>
    %313 = arith.addf %283, %312 : vector<8x1xf32>
    %cst_91 = arith.constant 0.000000e+00 : f32
    %314 = vector.broadcast %cst_91 : f32 to vector<8x1xf32>
    %315 = arith.subf %314, %98 : vector<8x1xf32>
    %316 = arith.mulf %315, %290 : vector<8x1xf32>
    %317 = arith.addf %316, %310 : vector<8x1xf32>
    %cst_92 = arith.constant 1.000000e-01 : f32
    %318 = vector.broadcast %cst_92 : f32 to vector<8x1xf32>
    %319 = arith.mulf %318, %317 : vector<8x1xf32>
    %320 = arith.addf %290, %319 : vector<8x1xf32>
    %c7_i32 = arith.constant 7 : i32
    %321 = vector.broadcast %c7_i32 : i32 to vector<1x16xi32>
    %322 = arith.cmpi eq, %107, %321 : vector<1x16xi32>
    %323 = arith.extui %322 : vector<1x16xi1> to vector<1x16xi32>
    %324 = arith.sitofp %323 : vector<1x16xi32> to vector<1x16xf32>
    %325 = vector.broadcast %313 : vector<8x1xf32> to vector<8x16xf32>
    %326 = vector.broadcast %324 : vector<1x16xf32> to vector<8x16xf32>
    %327 = arith.mulf %325, %326 : vector<8x16xf32>
    %328 = arith.addf %298, %327 : vector<8x16xf32>
    %329 = vector.broadcast %313 : vector<8x1xf32> to vector<8x32xf32>
    %330 = vector.broadcast %104 : vector<1x32xf32> to vector<8x32xf32>
    %331 = arith.mulf %329, %330 : vector<8x32xf32>
    %332 = arith.addf %103, %331 : vector<8x32xf32>
    %cst_93 = arith.constant 0.000000e+00 : f32
    %333 = vector.broadcast %cst_93 : f32 to vector<8x32xf32>
    %334 = arith.maximumf %332, %333 : vector<8x32xf32>
    %335 = vector.broadcast %105 : vector<1x32xf32> to vector<8x32xf32>
    %336 = arith.mulf %334, %335 : vector<8x32xf32>
    %cst_94 = arith.constant dense<0.000000e+00> : vector<8xf32>
    %337 = vector.multi_reduction <add>, %336, %cst_94 [1] : vector<8x32xf32> to vector<8xf32>
    %338 = vector.shape_cast %337 : vector<8xf32> to vector<8x1xf32>
    %339 = vector.broadcast %106 : vector<1x1xf32> to vector<8x1xf32>
    %340 = arith.addf %338, %339 : vector<8x1xf32>
    %cst_95 = arith.constant 1.000000e-01 : f32
    %341 = vector.broadcast %cst_95 : f32 to vector<8x1xf32>
    %342 = arith.mulf %341, %320 : vector<8x1xf32>
    %343 = arith.addf %313, %342 : vector<8x1xf32>
    %cst_96 = arith.constant 0.000000e+00 : f32
    %344 = vector.broadcast %cst_96 : f32 to vector<8x1xf32>
    %345 = arith.subf %344, %98 : vector<8x1xf32>
    %346 = arith.mulf %345, %320 : vector<8x1xf32>
    %347 = arith.addf %346, %340 : vector<8x1xf32>
    %cst_97 = arith.constant 1.000000e-01 : f32
    %348 = vector.broadcast %cst_97 : f32 to vector<8x1xf32>
    %349 = arith.mulf %348, %347 : vector<8x1xf32>
    %350 = arith.addf %320, %349 : vector<8x1xf32>
    %c8_i32 = arith.constant 8 : i32
    %351 = vector.broadcast %c8_i32 : i32 to vector<1x16xi32>
    %352 = arith.cmpi eq, %107, %351 : vector<1x16xi32>
    %353 = arith.extui %352 : vector<1x16xi1> to vector<1x16xi32>
    %354 = arith.sitofp %353 : vector<1x16xi32> to vector<1x16xf32>
    %355 = vector.broadcast %343 : vector<8x1xf32> to vector<8x16xf32>
    %356 = vector.broadcast %354 : vector<1x16xf32> to vector<8x16xf32>
    %357 = arith.mulf %355, %356 : vector<8x16xf32>
    %358 = arith.addf %328, %357 : vector<8x16xf32>
    %359 = vector.broadcast %343 : vector<8x1xf32> to vector<8x32xf32>
    %360 = vector.broadcast %104 : vector<1x32xf32> to vector<8x32xf32>
    %361 = arith.mulf %359, %360 : vector<8x32xf32>
    %362 = arith.addf %103, %361 : vector<8x32xf32>
    %cst_98 = arith.constant 0.000000e+00 : f32
    %363 = vector.broadcast %cst_98 : f32 to vector<8x32xf32>
    %364 = arith.maximumf %362, %363 : vector<8x32xf32>
    %365 = vector.broadcast %105 : vector<1x32xf32> to vector<8x32xf32>
    %366 = arith.mulf %364, %365 : vector<8x32xf32>
    %cst_99 = arith.constant dense<0.000000e+00> : vector<8xf32>
    %367 = vector.multi_reduction <add>, %366, %cst_99 [1] : vector<8x32xf32> to vector<8xf32>
    %368 = vector.shape_cast %367 : vector<8xf32> to vector<8x1xf32>
    %369 = vector.broadcast %106 : vector<1x1xf32> to vector<8x1xf32>
    %370 = arith.addf %368, %369 : vector<8x1xf32>
    %cst_100 = arith.constant 1.000000e-01 : f32
    %371 = vector.broadcast %cst_100 : f32 to vector<8x1xf32>
    %372 = arith.mulf %371, %350 : vector<8x1xf32>
    %373 = arith.addf %343, %372 : vector<8x1xf32>
    %cst_101 = arith.constant 0.000000e+00 : f32
    %374 = vector.broadcast %cst_101 : f32 to vector<8x1xf32>
    %375 = arith.subf %374, %98 : vector<8x1xf32>
    %376 = arith.mulf %375, %350 : vector<8x1xf32>
    %377 = arith.addf %376, %370 : vector<8x1xf32>
    %cst_102 = arith.constant 1.000000e-01 : f32
    %378 = vector.broadcast %cst_102 : f32 to vector<8x1xf32>
    %379 = arith.mulf %378, %377 : vector<8x1xf32>
    %380 = arith.addf %350, %379 : vector<8x1xf32>
    %c9_i32 = arith.constant 9 : i32
    %381 = vector.broadcast %c9_i32 : i32 to vector<1x16xi32>
    %382 = arith.cmpi eq, %107, %381 : vector<1x16xi32>
    %383 = arith.extui %382 : vector<1x16xi1> to vector<1x16xi32>
    %384 = arith.sitofp %383 : vector<1x16xi32> to vector<1x16xf32>
    %385 = vector.broadcast %373 : vector<8x1xf32> to vector<8x16xf32>
    %386 = vector.broadcast %384 : vector<1x16xf32> to vector<8x16xf32>
    %387 = arith.mulf %385, %386 : vector<8x16xf32>
    %388 = arith.addf %358, %387 : vector<8x16xf32>
    %389 = vector.broadcast %373 : vector<8x1xf32> to vector<8x32xf32>
    %390 = vector.broadcast %104 : vector<1x32xf32> to vector<8x32xf32>
    %391 = arith.mulf %389, %390 : vector<8x32xf32>
    %392 = arith.addf %103, %391 : vector<8x32xf32>
    %cst_103 = arith.constant 0.000000e+00 : f32
    %393 = vector.broadcast %cst_103 : f32 to vector<8x32xf32>
    %394 = arith.maximumf %392, %393 : vector<8x32xf32>
    %395 = vector.broadcast %105 : vector<1x32xf32> to vector<8x32xf32>
    %396 = arith.mulf %394, %395 : vector<8x32xf32>
    %cst_104 = arith.constant dense<0.000000e+00> : vector<8xf32>
    %397 = vector.multi_reduction <add>, %396, %cst_104 [1] : vector<8x32xf32> to vector<8xf32>
    %398 = vector.shape_cast %397 : vector<8xf32> to vector<8x1xf32>
    %399 = vector.broadcast %106 : vector<1x1xf32> to vector<8x1xf32>
    %400 = arith.addf %398, %399 : vector<8x1xf32>
    %cst_105 = arith.constant 1.000000e-01 : f32
    %401 = vector.broadcast %cst_105 : f32 to vector<8x1xf32>
    %402 = arith.mulf %401, %380 : vector<8x1xf32>
    %403 = arith.addf %373, %402 : vector<8x1xf32>
    %cst_106 = arith.constant 0.000000e+00 : f32
    %404 = vector.broadcast %cst_106 : f32 to vector<8x1xf32>
    %405 = arith.subf %404, %98 : vector<8x1xf32>
    %406 = arith.mulf %405, %380 : vector<8x1xf32>
    %407 = arith.addf %406, %400 : vector<8x1xf32>
    %cst_107 = arith.constant 1.000000e-01 : f32
    %408 = vector.broadcast %cst_107 : f32 to vector<8x1xf32>
    %409 = arith.mulf %408, %407 : vector<8x1xf32>
    %410 = arith.addf %380, %409 : vector<8x1xf32>
    %c10_i32 = arith.constant 10 : i32
    %411 = vector.broadcast %c10_i32 : i32 to vector<1x16xi32>
    %412 = arith.cmpi eq, %107, %411 : vector<1x16xi32>
    %413 = arith.extui %412 : vector<1x16xi1> to vector<1x16xi32>
    %414 = arith.sitofp %413 : vector<1x16xi32> to vector<1x16xf32>
    %415 = vector.broadcast %403 : vector<8x1xf32> to vector<8x16xf32>
    %416 = vector.broadcast %414 : vector<1x16xf32> to vector<8x16xf32>
    %417 = arith.mulf %415, %416 : vector<8x16xf32>
    %418 = arith.addf %388, %417 : vector<8x16xf32>
    %419 = vector.broadcast %403 : vector<8x1xf32> to vector<8x32xf32>
    %420 = vector.broadcast %104 : vector<1x32xf32> to vector<8x32xf32>
    %421 = arith.mulf %419, %420 : vector<8x32xf32>
    %422 = arith.addf %103, %421 : vector<8x32xf32>
    %cst_108 = arith.constant 0.000000e+00 : f32
    %423 = vector.broadcast %cst_108 : f32 to vector<8x32xf32>
    %424 = arith.maximumf %422, %423 : vector<8x32xf32>
    %425 = vector.broadcast %105 : vector<1x32xf32> to vector<8x32xf32>
    %426 = arith.mulf %424, %425 : vector<8x32xf32>
    %cst_109 = arith.constant dense<0.000000e+00> : vector<8xf32>
    %427 = vector.multi_reduction <add>, %426, %cst_109 [1] : vector<8x32xf32> to vector<8xf32>
    %428 = vector.shape_cast %427 : vector<8xf32> to vector<8x1xf32>
    %429 = vector.broadcast %106 : vector<1x1xf32> to vector<8x1xf32>
    %430 = arith.addf %428, %429 : vector<8x1xf32>
    %cst_110 = arith.constant 1.000000e-01 : f32
    %431 = vector.broadcast %cst_110 : f32 to vector<8x1xf32>
    %432 = arith.mulf %431, %410 : vector<8x1xf32>
    %433 = arith.addf %403, %432 : vector<8x1xf32>
    %cst_111 = arith.constant 0.000000e+00 : f32
    %434 = vector.broadcast %cst_111 : f32 to vector<8x1xf32>
    %435 = arith.subf %434, %98 : vector<8x1xf32>
    %436 = arith.mulf %435, %410 : vector<8x1xf32>
    %437 = arith.addf %436, %430 : vector<8x1xf32>
    %cst_112 = arith.constant 1.000000e-01 : f32
    %438 = vector.broadcast %cst_112 : f32 to vector<8x1xf32>
    %439 = arith.mulf %438, %437 : vector<8x1xf32>
    %440 = arith.addf %410, %439 : vector<8x1xf32>
    %c11_i32 = arith.constant 11 : i32
    %441 = vector.broadcast %c11_i32 : i32 to vector<1x16xi32>
    %442 = arith.cmpi eq, %107, %441 : vector<1x16xi32>
    %443 = arith.extui %442 : vector<1x16xi1> to vector<1x16xi32>
    %444 = arith.sitofp %443 : vector<1x16xi32> to vector<1x16xf32>
    %445 = vector.broadcast %433 : vector<8x1xf32> to vector<8x16xf32>
    %446 = vector.broadcast %444 : vector<1x16xf32> to vector<8x16xf32>
    %447 = arith.mulf %445, %446 : vector<8x16xf32>
    %448 = arith.addf %418, %447 : vector<8x16xf32>
    %449 = vector.broadcast %433 : vector<8x1xf32> to vector<8x32xf32>
    %450 = vector.broadcast %104 : vector<1x32xf32> to vector<8x32xf32>
    %451 = arith.mulf %449, %450 : vector<8x32xf32>
    %452 = arith.addf %103, %451 : vector<8x32xf32>
    %cst_113 = arith.constant 0.000000e+00 : f32
    %453 = vector.broadcast %cst_113 : f32 to vector<8x32xf32>
    %454 = arith.maximumf %452, %453 : vector<8x32xf32>
    %455 = vector.broadcast %105 : vector<1x32xf32> to vector<8x32xf32>
    %456 = arith.mulf %454, %455 : vector<8x32xf32>
    %cst_114 = arith.constant dense<0.000000e+00> : vector<8xf32>
    %457 = vector.multi_reduction <add>, %456, %cst_114 [1] : vector<8x32xf32> to vector<8xf32>
    %458 = vector.shape_cast %457 : vector<8xf32> to vector<8x1xf32>
    %459 = vector.broadcast %106 : vector<1x1xf32> to vector<8x1xf32>
    %460 = arith.addf %458, %459 : vector<8x1xf32>
    %cst_115 = arith.constant 1.000000e-01 : f32
    %461 = vector.broadcast %cst_115 : f32 to vector<8x1xf32>
    %462 = arith.mulf %461, %440 : vector<8x1xf32>
    %463 = arith.addf %433, %462 : vector<8x1xf32>
    %cst_116 = arith.constant 0.000000e+00 : f32
    %464 = vector.broadcast %cst_116 : f32 to vector<8x1xf32>
    %465 = arith.subf %464, %98 : vector<8x1xf32>
    %466 = arith.mulf %465, %440 : vector<8x1xf32>
    %467 = arith.addf %466, %460 : vector<8x1xf32>
    %cst_117 = arith.constant 1.000000e-01 : f32
    %468 = vector.broadcast %cst_117 : f32 to vector<8x1xf32>
    %469 = arith.mulf %468, %467 : vector<8x1xf32>
    %470 = arith.addf %440, %469 : vector<8x1xf32>
    %c12_i32 = arith.constant 12 : i32
    %471 = vector.broadcast %c12_i32 : i32 to vector<1x16xi32>
    %472 = arith.cmpi eq, %107, %471 : vector<1x16xi32>
    %473 = arith.extui %472 : vector<1x16xi1> to vector<1x16xi32>
    %474 = arith.sitofp %473 : vector<1x16xi32> to vector<1x16xf32>
    %475 = vector.broadcast %463 : vector<8x1xf32> to vector<8x16xf32>
    %476 = vector.broadcast %474 : vector<1x16xf32> to vector<8x16xf32>
    %477 = arith.mulf %475, %476 : vector<8x16xf32>
    %478 = arith.addf %448, %477 : vector<8x16xf32>
    %479 = vector.broadcast %463 : vector<8x1xf32> to vector<8x32xf32>
    %480 = vector.broadcast %104 : vector<1x32xf32> to vector<8x32xf32>
    %481 = arith.mulf %479, %480 : vector<8x32xf32>
    %482 = arith.addf %103, %481 : vector<8x32xf32>
    %cst_118 = arith.constant 0.000000e+00 : f32
    %483 = vector.broadcast %cst_118 : f32 to vector<8x32xf32>
    %484 = arith.maximumf %482, %483 : vector<8x32xf32>
    %485 = vector.broadcast %105 : vector<1x32xf32> to vector<8x32xf32>
    %486 = arith.mulf %484, %485 : vector<8x32xf32>
    %cst_119 = arith.constant dense<0.000000e+00> : vector<8xf32>
    %487 = vector.multi_reduction <add>, %486, %cst_119 [1] : vector<8x32xf32> to vector<8xf32>
    %488 = vector.shape_cast %487 : vector<8xf32> to vector<8x1xf32>
    %489 = vector.broadcast %106 : vector<1x1xf32> to vector<8x1xf32>
    %490 = arith.addf %488, %489 : vector<8x1xf32>
    %cst_120 = arith.constant 1.000000e-01 : f32
    %491 = vector.broadcast %cst_120 : f32 to vector<8x1xf32>
    %492 = arith.mulf %491, %470 : vector<8x1xf32>
    %493 = arith.addf %463, %492 : vector<8x1xf32>
    %cst_121 = arith.constant 0.000000e+00 : f32
    %494 = vector.broadcast %cst_121 : f32 to vector<8x1xf32>
    %495 = arith.subf %494, %98 : vector<8x1xf32>
    %496 = arith.mulf %495, %470 : vector<8x1xf32>
    %497 = arith.addf %496, %490 : vector<8x1xf32>
    %cst_122 = arith.constant 1.000000e-01 : f32
    %498 = vector.broadcast %cst_122 : f32 to vector<8x1xf32>
    %499 = arith.mulf %498, %497 : vector<8x1xf32>
    %500 = arith.addf %470, %499 : vector<8x1xf32>
    %c13_i32 = arith.constant 13 : i32
    %501 = vector.broadcast %c13_i32 : i32 to vector<1x16xi32>
    %502 = arith.cmpi eq, %107, %501 : vector<1x16xi32>
    %503 = arith.extui %502 : vector<1x16xi1> to vector<1x16xi32>
    %504 = arith.sitofp %503 : vector<1x16xi32> to vector<1x16xf32>
    %505 = vector.broadcast %493 : vector<8x1xf32> to vector<8x16xf32>
    %506 = vector.broadcast %504 : vector<1x16xf32> to vector<8x16xf32>
    %507 = arith.mulf %505, %506 : vector<8x16xf32>
    %508 = arith.addf %478, %507 : vector<8x16xf32>
    %509 = vector.broadcast %493 : vector<8x1xf32> to vector<8x32xf32>
    %510 = vector.broadcast %104 : vector<1x32xf32> to vector<8x32xf32>
    %511 = arith.mulf %509, %510 : vector<8x32xf32>
    %512 = arith.addf %103, %511 : vector<8x32xf32>
    %cst_123 = arith.constant 0.000000e+00 : f32
    %513 = vector.broadcast %cst_123 : f32 to vector<8x32xf32>
    %514 = arith.maximumf %512, %513 : vector<8x32xf32>
    %515 = vector.broadcast %105 : vector<1x32xf32> to vector<8x32xf32>
    %516 = arith.mulf %514, %515 : vector<8x32xf32>
    %cst_124 = arith.constant dense<0.000000e+00> : vector<8xf32>
    %517 = vector.multi_reduction <add>, %516, %cst_124 [1] : vector<8x32xf32> to vector<8xf32>
    %518 = vector.shape_cast %517 : vector<8xf32> to vector<8x1xf32>
    %519 = vector.broadcast %106 : vector<1x1xf32> to vector<8x1xf32>
    %520 = arith.addf %518, %519 : vector<8x1xf32>
    %cst_125 = arith.constant 1.000000e-01 : f32
    %521 = vector.broadcast %cst_125 : f32 to vector<8x1xf32>
    %522 = arith.mulf %521, %500 : vector<8x1xf32>
    %523 = arith.addf %493, %522 : vector<8x1xf32>
    %cst_126 = arith.constant 0.000000e+00 : f32
    %524 = vector.broadcast %cst_126 : f32 to vector<8x1xf32>
    %525 = arith.subf %524, %98 : vector<8x1xf32>
    %526 = arith.mulf %525, %500 : vector<8x1xf32>
    %527 = arith.addf %526, %520 : vector<8x1xf32>
    %cst_127 = arith.constant 1.000000e-01 : f32
    %528 = vector.broadcast %cst_127 : f32 to vector<8x1xf32>
    %529 = arith.mulf %528, %527 : vector<8x1xf32>
    %530 = arith.addf %500, %529 : vector<8x1xf32>
    %c14_i32 = arith.constant 14 : i32
    %531 = vector.broadcast %c14_i32 : i32 to vector<1x16xi32>
    %532 = arith.cmpi eq, %107, %531 : vector<1x16xi32>
    %533 = arith.extui %532 : vector<1x16xi1> to vector<1x16xi32>
    %534 = arith.sitofp %533 : vector<1x16xi32> to vector<1x16xf32>
    %535 = vector.broadcast %523 : vector<8x1xf32> to vector<8x16xf32>
    %536 = vector.broadcast %534 : vector<1x16xf32> to vector<8x16xf32>
    %537 = arith.mulf %535, %536 : vector<8x16xf32>
    %538 = arith.addf %508, %537 : vector<8x16xf32>
    %cst_128 = arith.constant 1.000000e-01 : f32
    %539 = vector.broadcast %cst_128 : f32 to vector<8x1xf32>
    %540 = arith.mulf %539, %530 : vector<8x1xf32>
    %541 = arith.addf %523, %540 : vector<8x1xf32>
    %c15_i32 = arith.constant 15 : i32
    %542 = vector.broadcast %c15_i32 : i32 to vector<1x16xi32>
    %543 = arith.cmpi eq, %107, %542 : vector<1x16xi32>
    %544 = arith.extui %543 : vector<1x16xi1> to vector<1x16xi32>
    %545 = arith.sitofp %544 : vector<1x16xi32> to vector<1x16xf32>
    %546 = vector.broadcast %541 : vector<8x1xf32> to vector<8x16xf32>
    %547 = vector.broadcast %545 : vector<1x16xf32> to vector<8x16xf32>
    %548 = arith.mulf %546, %547 : vector<8x16xf32>
    %549 = arith.addf %538, %548 : vector<8x16xf32>
    %c600 = arith.constant 600 : index
    %c0_129 = arith.constant 0 : index
    %550 = vector.load %arg2[%c600, %c0_129] : memref<664x128xf32, #tpu.memory_space<vmem>>, vector<1x32xf32>
    %551 = vector.broadcast %98 : vector<8x1xf32> to vector<8x32xf32>
    %552 = vector.broadcast %550 : vector<1x32xf32> to vector<8x32xf32>
    %553 = arith.mulf %551, %552 : vector<8x32xf32>
    %c608 = arith.constant 608 : index
    %c0_130 = arith.constant 0 : index
    %554 = vector.load %arg2[%c608, %c0_130] : memref<664x128xf32, #tpu.memory_space<vmem>>, vector<8x32xf32>
    %cst_131 = arith.constant dense<0.000000e+00> : vector<8x32xf32>
    %555 = tpu.matmul %89, %554, %cst_131 {dimension_numbers = #tpu.dot_dimension_numbers<[1], [0], [0], [1], [0, 0, 1, 1], [], []>} : vector<8x8xf32>, vector<8x32xf32>, vector<8x32xf32> -> vector<8x32xf32>
    %556 = arith.addf %553, %555 : vector<8x32xf32>
    %c616 = arith.constant 616 : index
    %c0_132 = arith.constant 0 : index
    %557 = vector.load %arg2[%c616, %c0_132] : memref<664x128xf32, #tpu.memory_space<vmem>>, vector<1x32xf32>
    %558 = vector.broadcast %557 : vector<1x32xf32> to vector<8x32xf32>
    %559 = arith.addf %556, %558 : vector<8x32xf32>
    %cst_133 = arith.constant 0.000000e+00 : f32
    %560 = vector.broadcast %cst_133 : f32 to vector<8x32xf32>
    %561 = arith.maximumf %559, %560 : vector<8x32xf32>
    %c624 = arith.constant 624 : index
    %c0_134 = arith.constant 0 : index
    %562 = vector.load %arg2[%c624, %c0_134] : memref<664x128xf32, #tpu.memory_space<vmem>>, vector<32x16xf32>
    %cst_135 = arith.constant dense<0.000000e+00> : vector<8x16xf32>
    %563 = tpu.matmul %561, %562, %cst_135 {dimension_numbers = #tpu.dot_dimension_numbers<[1], [0], [0], [1], [0, 0, 1, 1], [], []>} : vector<8x32xf32>, vector<32x16xf32>, vector<8x16xf32> -> vector<8x16xf32>
    %c656 = arith.constant 656 : index
    %c0_136 = arith.constant 0 : index
    %564 = vector.load %arg2[%c656, %c0_136] : memref<664x128xf32, #tpu.memory_space<vmem>>, vector<1x16xf32>
    %565 = vector.broadcast %564 : vector<1x16xf32> to vector<8x16xf32>
    %566 = arith.addf %563, %565 : vector<8x16xf32>
    %567 = arith.addf %549, %566 : vector<8x16xf32>
    %cst_137 = arith.constant 0.000000e+00 : f32
    %568 = vector.broadcast %cst_137 : f32 to vector<8x128xf32>
    %c0_138 = arith.constant 0 : index
    %c0_139 = arith.constant 0 : index
    %569 = vector.load %arg3[%c0_138, %c0_139] : memref<8x128xf32, #tpu.memory_space<vmem>>, vector<8x128xf32>
    tpu.vector_store %arg3[%c0_138, %c0_139], %568 {strides = array<i32>} : memref<8x128xf32, #tpu.memory_space<vmem>>, vector<8x128xf32>,
    %c0_140 = arith.constant 0 : index
    %c0_141 = arith.constant 0 : index
    %570 = vector.load %arg3[%c0_140, %c0_141] : memref<8x128xf32, #tpu.memory_space<vmem>>, vector<8x1xf32>
    tpu.vector_store %arg3[%c0_140, %c0_141], %81 {strides = array<i32>} : memref<8x128xf32, #tpu.memory_space<vmem>>, vector<8x1xf32>,
    %c0_142 = arith.constant 0 : index
    %c1 = arith.constant 1 : index
    %571 = vector.load %arg3[%c0_142, %c1] : memref<8x128xf32, #tpu.memory_space<vmem>>, vector<8x1xf32>
    tpu.vector_store %arg3[%c0_142, %c1], %82 {strides = array<i32>} : memref<8x128xf32, #tpu.memory_space<vmem>>, vector<8x1xf32>,
    %c0_143 = arith.constant 0 : index
    %c2 = arith.constant 2 : index
    %572 = vector.load %arg3[%c0_143, %c2] : memref<8x128xf32, #tpu.memory_space<vmem>>, vector<8x16xf32>
    tpu.vector_store %arg3[%c0_143, %c2], %28 {strides = array<i32>} : memref<8x128xf32, #tpu.memory_space<vmem>>, vector<8x16xf32>,
    %c0_144 = arith.constant 0 : index
    %c18 = arith.constant 18 : index
    %573 = vector.load %arg3[%c0_144, %c18] : memref<8x128xf32, #tpu.memory_space<vmem>>, vector<8x16xf32>
    tpu.vector_store %arg3[%c0_144, %c18], %567 {strides = array<i32>} : memref<8x128xf32, #tpu.memory_space<vmem>>, vector<8x16xf32>,
    return
  }
  func.func @transform_0(%arg0: i32) -> (i32, i32) {
    %c0_i32 = arith.constant 0 : i32
    %c0_i32_0 = arith.constant 0 : i32
    %c0_i32_1 = arith.constant 0 : i32
    return %c0_i32, %c0_i32_0 : i32, i32
  }
  func.func @transform_1(%arg0: i32) -> (i32, i32) {
    %c0_i32 = arith.constant 0 : i32
    %c0_i32_0 = arith.constant 0 : i32
    %c0_i32_1 = arith.constant 0 : i32
    return %c0_i32, %c0_i32_0 : i32, i32
  }
  func.func @transform_2(%arg0: i32) -> (i32, i32) {
    %c0_i32 = arith.constant 0 : i32
    %c0_i32_0 = arith.constant 0 : i32
    %c0_i32_1 = arith.constant 0 : i32
    return %c0_i32, %c0_i32_0 : i32, i32
  }
}

</mosaic_0001>

<bundles_post_ra>
// kernel: tpu_custom_call.1
= control target key start
LH: loop header
LB: loop body
LE: loop exit
PB: predicated region body
PF: predicated region fallthrough
CT: control target
= control target key end

     0   :  { %7 = vsyncpa [#allocation3], 0  ;;  %s2460_s0 = inlined_call_operand.hbm [shape: f32[8,32], index: 0, kind: input, shape index: {}]   ;;  %s2461_s1 = inlined_call_operand.hbm [shape: f32[664,128], index: 1, kind: input, shape index: {}]   ;;  %s2462_s2 = inlined_call_operand.hbm [shape: f32[8,128], index: 2, kind: output, shape index: {}]  }
   0x1   :  { %8 = vsyncpa [#allocation6], 0 }
   0x2   :  { %9 = vsyncpa [#allocation4], 0  ;;  %s2146_s9 = smov [#allocation2]   ;;  %s2147_s11 = smov [#allocation5]  }
   0x3   :  { %s16_s10 = sshll.u32 %s2146_s9, 4  ;;  %s25_s12 = sshll.u32 %s2147_s11, 4  ;;  %s17_s10 = int_to_ptr.vmem [resolvable:$true] %s16_s10  ;;  %s2176_s12 = int_to_ptr.vmem [resolvable:$true] %s25_s12 }
   0x4   :  { %s2074_s15 = scalar_lea.hbm %s2460_s0, 128 }
   0x5   :  { %p2075_p0 = scmp.ne.s32.totalorder %s2460_s0, %s2074_s15  ;;  %p2078_p1 = scmp.lt.u32.totalorder %s2074_s15, %s2460_s0 }
   0x7   :  { %p2080_p2 = pnand %p2078_p1, %p2075_p0 }
   0x9   :  { %2083 = shalt.err (!%p2080_p2)
}
   0xa   :  { %s2084_s20 = scalar_lea.vmem %s17_s10, 128  ;;  %p2089_p4 = scmp.lt.s32.totalorder %s17_s10, %s17_s10 }
   0xb   :  { %p2085_p3 = scmp.ne.s32.totalorder %s17_s10, %s2084_s20  ;;  %p2090_p5 = scmp.lt.s32.totalorder %s2084_s20, %s2084_s20 }
   0xd   :  { %p2091_p6 = por %p2090_p5, %p2089_p4 }
   0xf   :  { %p2092_p7 = pnand %p2091_p6, %p2085_p3 }
  0x11   :  { %2095 = shalt.err (!%p2092_p7)
}
  0x12   :  { %19 = dma.hbm_to_vmem [thread:$0]  %s2460_s0, 128, %s17_s10, [#allocation3]  }
  0x13   :  { %s2096_s25 = scalar_lea.hbm %s2461_s1, 10624 }
  0x14   :  { %p2097_p8 = scmp.ne.s32.totalorder %s2461_s1, %s2096_s25  ;;  %p2100_p9 = scmp.lt.u32.totalorder %s2096_s25, %s2461_s1 }
  0x16   :  { %p2102_p10 = pnand %p2100_p9, %p2097_p8 }
  0x18   :  { %2105 = shalt.err (!%p2102_p10)
}
  0x19   :  { %s2106_s30 = scalar_lea.vmem %s2176_s12, 10624  ;;  %p2111_p12 = scmp.lt.s32.totalorder %s2176_s12, %s2176_s12 }
  0x1a   :  { %p2107_p11 = scmp.ne.s32.totalorder %s2176_s12, %s2106_s30  ;;  %p2112_p13 = scmp.lt.s32.totalorder %s2106_s30, %s2106_s30 }
  0x1c   :  { %p2113_p0 = por %p2112_p13, %p2111_p12 }
  0x1e   :  { %p2114_p1 = pnand %p2113_p0, %p2107_p11 }
  0x20   :  { %2117 = shalt.err (!%p2114_p1)
}
  0x21   :  { %s2148_s0 = smov 128   ;;  %s2149_s3 = smov 8  }
  0x22   :  { %31 = dma.hbm_to_vmem [thread:$0]  %s2461_s1, 10624, %s2176_s12, [#allocation6], %s2148_s0, %s2148_s0, %s2149_s3  }
  0x23   :  { %2140 = dma.done.wait [#allocation3], 128  }
  0x24   :  { %2141 = vsyncadd [#allocation3], 4294967168 }
  0x25   :  { %2142 = dma.done.wait [#allocation6], 10624  }
  0x26   :  { %2143 = vsyncadd [#allocation6], 4294956672  ;;  %v2150_v0 = vmov 0.0|0.0   ;;  %vm2151_vm0 = vmmov 0   ;;  %v2152_v1 = vmov 0.0   ;;  %v39_v2 = vld [vmem:[#allocation5] sm:$0xff] }
  0x27   :  { %1953 = vmatprep.subr.bf16.mxu1 %v2150_v0  ;;  %1783 = vmatprep.mubr.msk.f32.mxu1 %vm2151_vm0, %v2152_v1  ;;  %1621 = vst [vmem:[#allocation7] sm:$0xff] %v2152_v1  ;;  %v40_v3 = vld [vmem:[#allocation5 + $0x8] sm:$0xff]  ;;  %v121_v5 = vld [vmem:[#allocation5 + $0x18] sm:$0xff]  ;;  %v122_v6 = vld [vmem:[#allocation5 + $0x20] sm:$0xff]  ;;  %vm46_vm1 = vcmask 130048   ;;  %vm134_vm2 = vcmask 523264  }
  0x28   :  { %1968 = vmatprep.subr.bf16.mxu0 %v2150_v0  ;;  %1821 = vmatprep.mubr.msk.f32.mxu0 %vm2151_vm0, %v2152_v1  ;;  %v1954_v4 = vpack.c.bf16 %v40_v3, %v39_v2  ;;  %v2214_v7 = vld [vmem:[#allocation2] sm:$0xff]  ;;  %v1957_v8 = vpack.c.bf16 %v122_v6, %v121_v5  ;;  %v123_v9 = vld [vmem:[#allocation5 + $0x28] sm:$0xff]  ;;  %v124_v10 = vld [vmem:[#allocation5 + $0x30] sm:$0xff]  ;;  %s2153_s1 = smov 119   ;;  %s2154_s6 = smov 120   ;;  %vm545_vm3 = vcmask 261120  }
  0x29   :  { %v1960_v11 = vpack.c.bf16 %v124_v10, %v123_v9  ;;  %v125_v12 = vld [vmem:[#allocation5 + $0x38] sm:$0xff]  ;;  %v126_v13 = vld [vmem:[#allocation5 + $0x40] sm:$0xff]  ;;  %v127_v15 = vld [vmem:[#allocation5 + $0x48] sm:$0xff]  ;;  %971 = vrot.lane.b32.xlu0 %v2214_v7, %s2153_s1  ;;  %vm1000_vm4 = vcmask 64512   ;;  %s2156_s7 = smov 113   ;;  %s2157_s8 = smov 127  }
  0x2a   :  { %1955 = vmatpush3.bf16.msra.mxu1 %v1954_v4  ;;  %v1963_v14 = vpack.c.bf16 %v126_v13, %v125_v12  ;;  %v128_v16 = vld [vmem:[#allocation5 + $0x50] sm:$0xff]  ;;  %v209_v18 = vld [vmem:[#allocation5 + $0x60] sm:$0xff]  ;;  %v210_v19 = vld [vmem:[#allocation5 + $0x68] sm:$0xff]  ;;  %vm1622_vm5 = vcmask 7168   ;;  %vm1624_vm6 = vcmask 15368   ;;  %s2158_s9 = smov 2  }
  0x2b   :  { %1956 = vmatprep.subr.bf16.mxu1 %v2150_v0  ;;  %v1966_v17 = vpack.c.bf16 %v128_v16, %v127_v15  ;;  %v211_v20 = vld [vmem:[#allocation5 + $0x70] sm:$0xff]  ;;  %v1969_v21 = vpack.c.bf16 %v210_v19, %v209_v18  ;;  %v212_v22 = vld [vmem:[#allocation5 + $0x78] sm:$0xff]  ;;  %v213_v24 = vld [vmem:[#allocation5 + $0x80] sm:$0xff]  ;;  %s2159_s10 = smov 18   ;;  %s2160_s11 = smov [#allocation7]  }
  0x2c   :  { %v1972_v23 = vpack.c.bf16 %v212_v22, %v211_v20  ;;  %v214_v25 = vld [vmem:[#allocation5 + $0x88] sm:$0xff]  ;;  %v1653_v27 = vld [vmem:[#allocation5 + $0x10] ss:$0 sm:$0xff]  ;;  %v216_v33 = vld [vmem:[#allocation5 + $0x98] sm:$0xff]  ;;  %s1643_s12 = sshll.u32 %s2160_s11, 4  ;;  %s1644_s12 = int_to_ptr.vmem [resolvable:$true] %s1643_s12 }
  0x2d   :  { %1784 = vmatmul.mubr.msk.f32.vlgmr.msra.gmra.mrb[0].mxu1 %vm46_vm1, %v2214_v7  ;;  %1970 = vmatpush3.bf16.msra.mxu0 %v1969_v21  ;;  %v1975_v26 = vpack.c.bf16 %v214_v25, %v213_v24  ;;  %v215_v32 = vld [vmem:[#allocation5 + $0x90] sm:$0xff]  ;;  %v296_v35 = vld [vmem:[#allocation5 + $0xa8] sm:$0xff]  ;;  %v298_v37 = vld [vmem:[#allocation5 + $0xb8] sm:$0xff]  ;;  %s2118_s13 = scalar_lea.vmem %s1644_s12, 128  ;;  %p2123_p3 = scmp.lt.s32.totalorder %s1644_s12, %s1644_s12 }
  0x2e   :  { %1958 = vmatpush3.bf16.msra.mxu1 %v1957_v8  ;;  %1802 = vmatprep.mubr.msk.f32.mxu1 %vm2151_vm0, %v2152_v1  ;;  %v1978_v34 = vpack.c.bf16 %v216_v33, %v215_v32  ;;  %v297_v36 = vld [vmem:[#allocation5 + $0xb0] sm:$0xff]  ;;  %v299_v39 = vld [vmem:[#allocation5 + $0xc0] sm:$0xff]  ;;  %v300_v41 = vld [vmem:[#allocation5 + $0xc8] sm:$0xff]  ;;  %p2119_p2 = scmp.ne.s32.totalorder %s1644_s12, %s2118_s13  ;;  %p2124_p4 = scmp.lt.s32.totalorder %s2118_s13, %s2118_s13 }
  0x2f   :  { %1959 = vmatprep.subr.bf16.mxu1 %v2150_v0  ;;  %1971 = vmatprep.subr.bf16.mxu0 %v2150_v0  ;;  %v1981_v38 = vpack.c.bf16 %v297_v36, %v296_v35  ;;  %v1984_v40 = vpack.c.bf16 %v299_v39, %v298_v37  ;;  %v301_v42 = vld [vmem:[#allocation5 + $0xd0] sm:$0xff]  ;;  %v302_v44 = vld [vmem:[#allocation5 + $0xd8] sm:$0xff]  ;;  %v303_v45 = vld [vmem:[#allocation5 + $0xe0] sm:$0xff] }
  0x30   :  { %v1987_v43 = vpack.c.bf16 %v301_v42, %v300_v41  ;;  %v1990_v46 = vpack.c.bf16 %v303_v45, %v302_v44  ;;  %v304_v47 = vld [vmem:[#allocation5 + $0xe8] sm:$0xff]  ;;  %v305_v48 = vld [vmem:[#allocation5 + $0xf0] sm:$0xff]  ;;  %v306_v50 = vld [vmem:[#allocation5 + $0xf8] sm:$0xff]  ;;  %p2125_p5 = por %p2124_p4, %p2123_p3 }
  0x31   :  { %1973 = vmatpush3.bf16.msra.mxu0 %v1972_v23  ;;  %v1993_v49 = vpack.c.bf16 %v305_v48, %v304_v47  ;;  %v307_v51 = vld [vmem:[#allocation5 + $0x100] sm:$0xff]  ;;  %v308_v53 = vld [vmem:[#allocation5 + $0x108] sm:$0xff]  ;;  %v309_v54 = vld [vmem:[#allocation5 + $0x110] sm:$0xff] }
  0x32   :  { %1961 = vmatpush3.bf16.msra.mxu1 %v1960_v11  ;;  %1974 = vmatprep.subr.bf16.mxu0 %v2150_v0  ;;  %v1996_v52 = vpack.c.bf16 %v307_v51, %v306_v50  ;;  %v1999_v55 = vpack.c.bf16 %v309_v54, %v308_v53  ;;  %v1655_v56 = vld [vmem:[#allocation5 + $0x58] ss:$0 sm:$0xff]  ;;  %v311_v62 = vld [vmem:[#allocation5 + $0x120] sm:$0xff]  ;;  %v390_v3 = vld [vmem:[#allocation5 + $0x148] sm:$0xff]  ;;  %p2126_p6 = pnand %p2125_p5, %p2119_p2 }
  0x33   :  { %1962 = vmatprep.subr.bf16.mxu1 %v2150_v0  ;;  %v310_v61 = vld [vmem:[#allocation5 + $0x118] sm:$0xff]  ;;  %v389_v2 = vld [vmem:[#allocation5 + $0x140] sm:$0xff]  ;;  %v387_v11 = vld [vmem:[#allocation5 + $0x130] sm:$0xff] }
  0x34   :  { %v2002_v63 = vpack.c.bf16 %v311_v62, %v310_v61  ;;  %v2005_v4 = vpack.c.bf16 %v390_v3, %v389_v2  ;;  %v1657_v5 = vld [vmem:[#allocation5 + $0xa0] ss:$0 sm:$0xff]  ;;  %v388_v12 = vld [vmem:[#allocation5 + $0x138] sm:$0xff]  ;;  %v1659_v13 = vld [vmem:[#allocation5 + $0x128] ss:$0 sm:$0xff]  ;;  %v2155_v3 = vmov 0  }
  0x35   :  { %1976 = vmatpush3.bf16.msra.mxu0 %v1975_v26  ;;  %v2008_v15 = vpack.c.bf16 %v388_v12, %v387_v11  ;;  %v541_v23 = vld [vmem:[#allocation5 + $0x158] sm:$0xff]  ;;  %v542_v24 = vld [vmem:[#allocation5 + $0x160] sm:$0xff]  ;;  %v543_v26 = vld [vmem:[#allocation5 + $0x168] sm:$0xff]  ;;  %2064 = vset.pattern.permute.xlu1 %v2155_v3 }
  0x36   :  { %1964 = vmatpush3.bf16.msra.mxu1 %v1963_v14  ;;  %1977 = vmatprep.subr.bf16.mxu0 %v2150_v0  ;;  %v2011_v25 = vpack.c.bf16 %v542_v24, %v541_v23  ;;  %v1662_v32 = vld [vmem:[#allocation5 + $0x150] ss:$0 sm:$0xff]  ;;  %v626_v37 = vld [vmem:[#allocation5 + $0x180] sm:$0xff]  ;;  %v709_v48 = vld [vmem:[#allocation5 + $0x1a8] sm:$0xff] }
  0x37   :  { %1965 = vmatprep.subr.bf16.mxu1 %v2150_v0  ;;  %v708_v41 = vld [vmem:[#allocation5 + $0x1a0] sm:$0xff]  ;;  %v1665_v51 = vld [vmem:[#allocation5 + $0x190] ss:$0 sm:$0xff]  ;;  %v791_v53 = vld [vmem:[#allocation5 + $0x1c8] sm:$0xff]  ;;  %2065 = vset.pattern.permute.xlu0 %v2155_v3 }
  0x38   :  { %v873_v62 = vld [vmem:[#allocation5 + $0x1e8] sm:$0xff]  ;;  %v875_v2 = vld [vmem:[#allocation5 + $0x1f8] sm:$0xff]  ;;  %1083 = vperm.xlu1 %2064, %v2214_v7   ;;  %v1669_v24 = vld [vmem:[#allocation5 + $0x1e0] ss:$0 sm:$0xff] }
  0x39   :  { %1979 = vmatpush3.bf16.msra.mxu0 %v1978_v34  ;;  %v1667_v11 = vld [vmem:[#allocation5 + $0x1b8] ss:$0 sm:$0xff] }
  0x3a   :  { %1967 = vmatpush3.bf16.msra.mxu1 %v1966_v17  ;;  %2004 = vmatprep.subr.bf16.mxu0 %v2150_v0 }
  0x3b   :  { %1980 = vmatprep.subr.bf16.mxu1 %v2150_v0 }
  0x3c   :  { %1119 = vperm.xlu1 %2064, %v2214_v7  }
  0x9b   :  { %v972_v20 = vpop.permute.xlu0 %971 }
 0x100   :  { %v116_v28 = vpop.f32.mrb[0].mxu1 }
 0x101   :  { %v117_v29 = vadd.f32 %v1653_v27, %v116_v28  ;;  %v1785_v30 = vpop.f32.mrb[1].mxu1  ;;  %v544_v27 = vld [vmem:[#allocation5 + $0x170] sm:$0xff] }
 0x102   :  { %v2014_v28 = vpack.c.bf16 %v544_v27, %v543_v26 }
 0x103   :  { %v120_v31 = vmax.f32 %v117_v29, 0.0 }
 0x105   :  { %1803 = vmatmul.mubr.msk.f32.vlgmr.msra.gmra.mrb[2].mxu1 %vm134_vm2, %v120_v31 }
 0x106   :  { %1856 = vmatprep.mubr.msk.f32.mxu1 %vm2151_vm0, %v2152_v1  ;;  %1982 = vmatpush3.bf16.msra.mxu1 %v1981_v38  ;;  %v627_v38 = vld [vmem:[#allocation5 + $0x188] sm:$0xff] }
 0x107   :  { %1983 = vmatprep.subr.bf16.mxu1 %v2150_v0  ;;  %v2017_v39 = vpack.c.bf16 %v627_v38, %v626_v37  ;;  %v2304_v38 = vld [vmem:[#allocation5 + $0x248] ss:$0 sm:$0xff] }
 0x10a   :  { %1985 = vmatpush3.bf16.msra.mxu1 %v1984_v40  ;;  %v707_v40 = vld [vmem:[#allocation5 + $0x198] sm:$0xff] }
 0x10b   :  { %1986 = vmatprep.subr.bf16.mxu1 %v2150_v0 }
 0x10e   :  { %1988 = vmatpush3.bf16.msra.mxu1 %v1987_v43  ;;  %v1664_v43 = vld [vmem:[#allocation5 + $0x178] ss:$0 sm:$0xff] }
 0x10f   :  { %1989 = vmatprep.subr.bf16.mxu1 %v2150_v0 }
 0x112   :  { %1991 = vmatpush3.bf16.msra.mxu1 %v1990_v46  ;;  %v2020_v46 = vpack.c.bf16 %v708_v41, %v707_v40 }
 0x113   :  { %1992 = vmatprep.subr.bf16.mxu1 %v2150_v0 }
 0x116   :  { %1994 = vmatpush3.bf16.msra.mxu1 %v1993_v49  ;;  %v710_v49 = vld [vmem:[#allocation5 + $0x1b0] sm:$0xff] }
 0x117   :  { %1995 = vmatprep.subr.bf16.mxu1 %v2150_v0  ;;  %v2023_v50 = vpack.c.bf16 %v710_v49, %v709_v48 }
 0x11a   :  { %1997 = vmatpush3.bf16.msra.mxu1 %v1996_v52  ;;  %v790_v52 = vld [vmem:[#allocation5 + $0x1c0] sm:$0xff] }
 0x11b   :  { %1998 = vmatprep.subr.bf16.mxu1 %v2150_v0 }
 0x11e   :  { %2000 = vmatpush3.bf16.msra.mxu1 %v1999_v55 }
 0x11f   :  { %2001 = vmatprep.subr.bf16.mxu1 %v2150_v0 }
 0x122   :  { %2003 = vmatpush3.bf16.msra.mxu1 %v2002_v63  ;;  %v874_v63 = vld [vmem:[#allocation5 + $0x1f0] sm:$0xff] }
 0x123   :  { %2031 = vmatprep.subr.bf16.mxu1 %v2150_v0 }
 0x1d8   :  { %v204_v57 = vpop.f32.mrb[2].mxu1 }
 0x1d9   :  { %v205_v58 = vadd.f32 %v1655_v56, %v204_v57  ;;  %v1804_v59 = vpop.f32.mrb[3].mxu1  ;;  %v2026_v57 = vpack.c.bf16 %v791_v53, %v790_v52 }
 0x1da   :  { %v792_v59 = vld [vmem:[#allocation5 + $0x1d0] sm:$0xff] }
 0x1db   :  { %v208_v60 = vmax.f32 %v205_v58, 0.0 }
 0x1dd   :  { %1822 = vmatmul.mubr.msk.f32.vlgmr.msra.gmra.mrb[0].mxu0 %vm134_vm2, %v208_v60  ;;  %v793_v60 = vld [vmem:[#allocation5 + $0x1d8] sm:$0xff] }
 0x1de   :  { %1863 = vmatprep.mubr.msk.f32.mxu0 %vm2151_vm0, %v2152_v1  ;;  %2006 = vmatpush3.bf16.msra.mxu0 %v2005_v4  ;;  %v2029_v61 = vpack.c.bf16 %v793_v60, %v792_v59  ;;  %v2032_v4 = vpack.c.bf16 %v874_v63, %v873_v62 }
 0x1df   :  { %2007 = vmatprep.subr.bf16.mxu0 %v2150_v0 }
 0x2b0   :  { %v291_v6 = vpop.f32.mrb[0].mxu0 }
 0x2b1   :  { %v292_v8 = vadd.f32 %v1657_v5, %v291_v6  ;;  %v1823_v9 = vpop.f32.mrb[1].mxu0  ;;  %v876_v5 = vld [vmem:[#allocation5 + $0x200] sm:$0xff] }
 0x2b2   :  { %v2035_v6 = vpack.c.bf16 %v876_v5, %v875_v2  ;;  %v878_v9 = vld [vmem:[#allocation5 + $0x210] sm:$0xff] }
 0x2b3   :  { %v295_v10 = vmax.f32 %v292_v8, 0.0  ;;  %v877_v8 = vld [vmem:[#allocation5 + $0x208] sm:$0xff] }
 0x2b5   :  { %1857 = vmatmul.mubr.f32.vlgmr.msra.gmra.mrb[4].mxu1 %v295_v10  ;;  %v2038_v10 = vpack.c.bf16 %v878_v9, %v877_v8 }
 0x2b6   :  { %1929 = vmatprep.mubr.msk.f32.mxu1 %vm2151_vm0, %v2152_v1  ;;  %2033 = vmatpush3.bf16.msra.mxu1 %v2032_v4 }
 0x2b7   :  { %2034 = vmatprep.subr.bf16.mxu1 %v2150_v0 }
 0x2ba   :  { %2036 = vmatpush3.bf16.msra.mxu1 %v2035_v6 }
 0x2bb   :  { %2037 = vmatprep.subr.bf16.mxu1 %v2150_v0 }
 0x2be   :  { %2039 = vmatpush3.bf16.msra.mxu1 %v2038_v10  ;;  %v2317_v10 = vld [vmem:[#allocation5 + $0x250] ss:$0 sm:$0xff] }
 0x2bf   :  { %2040 = vmatprep.subr.bf16.mxu1 %v2150_v0 }
 0x388   :  { %v383_v14 = vpop.f32.mrb[4].mxu1 }
 0x389   :  { %v2247_v16 = vadd.f32 %v1659_v13, %v383_v14  ;;  %v1858_v17 = vpop.f32.mrb[5].mxu1 }
 0x38a   :  { %v994_v17 = vld [vmem:[#allocation5 + $0x230] sm:$0xff] }
 0x38b   :  { %v968_v18 = vmul.f32 0.5, %v2247_v16  ;;  %1864 = vmatmul.mubr.msk.f32.vlgmr.msra.gmra.mrb[2].mxu0 %vm46_vm1, %v2247_v16 }
 0x38c   :  { %2009 = vmatpush3.bf16.msra.mxu0 %v2008_v15  ;;  %1870 = vmatprep.mubr.msk.f32.mxu0 %vm2151_vm0, %v2152_v1 }
 0x38d   :  { %v969_v19 = vmul.f32 1.442695, %v968_v18  ;;  %2010 = vmatprep.subr.bf16.mxu0 %v2150_v0 }
 0x38f   :  { %2066 = vpow2.f32 %v969_v19  ;;  %1871 = vmatmul.mubr.msk.f32.vlgmr.msra.gmra.mrb[4].mxu0 %vm46_vm1, %v2214_v7 }
 0x390   :  { %1881 = vmatprep.mubr.msk.f32.mxu0 %vm2151_vm0, %v2152_v1  ;;  %2012 = vmatpush3.bf16.msra.mxu0 %v2011_v25  ;;  %v2292_v25 = vld [vmem:[#allocation5 + $0x238] ss:$0 sm:$0xff] }
 0x391   :  { %2013 = vmatprep.subr.bf16.mxu0 %v2150_v0 }
 0x394   :  { %2015 = vmatpush3.bf16.msra.mxu0 %v2014_v28 }
 0x395   :  { %2016 = vmatprep.subr.bf16.mxu0 %v2150_v0 }
 0x399   :  { %v2067_v21 = vpop.eup %2066 }
 0x39a   :  { %v974_v22 = vmul.f32 %v2067_v21, %v972_v20  ;;  %v1459_v20 = vld [vmem:[#allocation5 + $0x260] sm:$0xff]  ;;  %v879_v21 = vld [vmem:[#allocation5 + $0x218] sm:$0xff] }
 0x39c   :  { %976 = vrot.lane.b32.xlu0 %v974_v22, %s2154_s6  ;;  %v880_v22 = vld [vmem:[#allocation5 + $0x220] sm:$0xff] }
 0x39d   :  { %v2041_v23 = vpack.c.bf16 %v880_v22, %v879_v21 }
 0x39f   :  { %2042 = vmatpush3.bf16.msra.mxu1 %v2041_v23 }
 0x3a0   :  { %983 = vrot.lane.b32.xlu0 %v2214_v7, %s2156_s7 }
 0x40e   :  { %v977_v18 = vpop.permute.xlu0 %976 }
 0x40f   :  { %v979_v19 = vadd.f32 %v977_v18, %v2247_v16 }
 0x412   :  { %v984_v52 = vpop.permute.xlu0 %983 }
 0x45e   :  { %v460_v29 = vpop.f32.mrb[2].mxu0 }
 0x45f   :  { %v1865_v30 = vpop.f32.mrb[3].mxu0 }
 0x460   :  { %v1673_v30 = vld [vmem:[#allocation5 + $0x240] ss:$0 sm:$0xff] }
 0x462   :  { %v530_v31 = vpop.f32.mrb[4].mxu0 }
 0x463   :  { %v531_v33 = vadd.f32 %v530_v31, %v460_v29  ;;  %v1872_v34 = vpop.f32.mrb[5].mxu0  ;;  %v2294_v29 = vpop.permute.xlu1 %1083 }
 0x464   :  { %v1092_v31 = vmul.f32 %v2292_v25, %v2294_v29 }
 0x465   :  { %v539_v35 = vadd.f32 %v1662_v32, %v531_v33 }
 0x467   :  { %v540_v36 = vmax.f32 %v539_v35, 0.0 }
 0x469   :  { %1882 = vmatmul.mubr.msk.f32.vlgmr.msra.gmra.mrb[6].mxu0 %vm545_vm3, %v540_v36 }
 0x46a   :  { %1888 = vmatprep.mubr.msk.f32.mxu0 %vm2151_vm0, %v2152_v1  ;;  %2018 = vmatpush3.bf16.msra.mxu0 %v2017_v39 }
 0x46b   :  { %2019 = vmatprep.subr.bf16.mxu0 %v2150_v0 }
 0x53c   :  { %v615_v42 = vpop.f32.mrb[6].mxu0 }
 0x53d   :  { %v619_v44 = vadd.f32 %v615_v42, %v2214_v7  ;;  %v1883_v45 = vpop.f32.mrb[7].mxu0 }
 0x53f   :  { %v625_v47 = vadd.f32 %v1664_v43, %v619_v44  ;;  %v1671_v43 = vld [vmem:[#allocation5 + $0x228] ss:$0 sm:$0xff] }
 0x541   :  { %1889 = vmatmul.mubr.msk.f32.vlgmr.msra.gmra.mrb[8].mxu0 %vm46_vm1, %v625_v47 }
 0x542   :  { %2021 = vmatpush3.bf16.msra.mxu0 %v2020_v46  ;;  %1899 = vmatprep.mubr.msk.f32.mxu0 %vm2151_vm0, %v2152_v1 }
 0x543   :  { %2022 = vmatprep.subr.bf16.mxu0 %v2150_v0 }
 0x546   :  { %2024 = vmatpush3.bf16.msra.mxu0 %v2023_v50 }
 0x547   :  { %2025 = vmatprep.subr.bf16.mxu0 %v2150_v0 }
 0x614   :  { %v702_v54 = vpop.f32.mrb[8].mxu0 }
 0x615   :  { %v703_v55 = vadd.f32 %v1665_v51, %v702_v54  ;;  %v1890_v56 = vpop.f32.mrb[9].mxu0 }
 0x617   :  { %v706_v58 = vmax.f32 %v703_v55, 0.0 }
 0x619   :  { %1900 = vmatmul.mubr.msk.f32.vlgmr.msra.gmra.mrb[10].mxu0 %vm545_vm3, %v706_v58 }
 0x61a   :  { %2027 = vmatpush3.bf16.msra.mxu0 %v2026_v57  ;;  %1910 = vmatprep.mubr.msk.f32.mxu0 %vm2151_vm0, %v2152_v1  ;;  %v2308_v57 = vpop.permute.xlu1 %1119 }
 0x61b   :  { %2028 = vmatprep.subr.bf16.mxu0 %v2150_v0 }
 0x61e   :  { %2030 = vmatpush3.bf16.msra.mxu0 %v2029_v61  ;;  %v1124_v61 = vmul.f32 %v2292_v25, %v2308_v57 }
 0x61f   :  { %1932 = vmatprep.subr.mxu0 %v2152_v1 }
 0x6ec   :  { %v785_v12 = vpop.f32.mrb[10].mxu0 }
 0x6ed   :  { %v786_v13 = vadd.f32 %v1667_v11, %v785_v12  ;;  %v1901_v14 = vpop.f32.mrb[11].mxu0 }
 0x6ef   :  { %v789_v15 = vmax.f32 %v786_v13, 0.0 }
 0x6f1   :  { %1911 = vmatmul.mubr.msk.f32.vlgmr.msra.gmra.mrb[12].mxu0 %vm545_vm3, %v789_v15 }
 0x6f2   :  { %1933 = vmatpush3.msra.mxu0 %v994_v17  ;;  %1934 = vmatprep.mubr.msk.f32.mxu0 %vm2151_vm0, %v2152_v1 }
 0x6f3   :  { %1937 = vmatprep.subr.mxu0 %v2152_v1 }
 0x6f5   :  { %1935 = vmatmul.mubr.msk.f32.vlgmr.msra.gmra.mrb[14].mxu0 %vm1000_vm4, %v979_v19 }
 0x6f6   :  { %1938 = vmatpush3.msra.mxu0 %v1459_v20  ;;  %1939 = vmatprep.mubr.msk.f32.mxu0 %vm2151_vm0, %v2152_v1 }
 0x6f7   :  { %2043 = vmatprep.subr.bf16.mxu0 %v2150_v0 }
 0x6f9   :  { %1940 = vmatmul.mubr.msk.f32.vlgmr.msra.gmra.mrb[16].mxu0 %vm1000_vm4, %v979_v19 }
 0x6fa   :  { %1950 = vmatprep.mubr.msk.f32.mxu0 %vm2151_vm0, %v2152_v1 }
 0x7c4   :  { %v868_v26 = vpop.f32.mrb[12].mxu0 }
 0x7c5   :  { %v869_v27 = vadd.f32 %v1669_v24, %v868_v26  ;;  %v1912_v28 = vpop.f32.mrb[13].mxu0 }
 0x7c7   :  { %v872_v32 = vmax.f32 %v869_v27, 0.0 }
 0x7c8   :  { %v1070_v33 = vpop.f32.mrb[14].mxu0 }
 0x7c9   :  { %v2298_v34 = vadd.f32 %v1673_v30, %v1070_v33  ;;  %1930 = vmatmul.mubr.msk.f32.vlgmr.msra.gmra.mrb[6].mxu1 %vm134_vm2, %v872_v32  ;;  %v1936_v35 = vpop.f32.mrb[15].mxu0 }
 0x7cb   :  { %v1093_v36 = vadd.f32 %v1092_v31, %v2298_v34  ;;  %v1125_v63 = vadd.f32 %v1124_v61, %v2298_v34 }
 0x7cc   :  { %v2302_v37 = vpop.f32.mrb[16].mxu0 }
 0x7cd   :  { %v1941_v39 = vpop.f32.mrb[17].mxu0  ;;  %v1094_v40 = vmax.f32 %v1093_v36, 0.0  ;;  %v1126_v2 = vmax.f32 %v1125_v63, 0.0 }
 0x7cf   :  { %v1099_v41 = vmul.f32 %v2304_v38, %v1094_v40  ;;  %v1127_v3 = vmul.f32 %v2304_v38, %v1126_v2 }
 0x7d1   :  { %v1100_v42 = vsel %vm545_vm3, %v1099_v41, 0.0  ;;  %v1128_v4 = vsel %vm545_vm3, %v1127_v3, 0.0 }
 0x7d2   :  { %1101 = vadd.xlane.f32.xlu1 %v1100_v42 }
 0x85f   :  { %v1102_v11 = vpop.xlane.xlu1 %1101 }
 0x860   :  { %v1107_v13 = vadd.f32 %v2317_v10, %v1102_v11 }
 0x89c   :  { %v955_v44 = vpop.f32.mrb[6].mxu1 }
 0x89d   :  { %v956_v45 = vadd.f32 %v1671_v43, %v955_v44  ;;  %v1931_v46 = vpop.f32.mrb[7].mxu1 }
 0x89f   :  { %v960_v47 = vand.u32 2147483647, %v956_v45  ;;  %v980_v48 = vmul.f32 0.5, %v956_v45  ;;  %v959_v59 = vmax.f32 %v956_v45, 0.0 }
 0x8a1   :  { %v961_v49 = vsub.f32 0.0, %v960_v47  ;;  %v981_v50 = vmul.f32 1.442695, %v980_v48 }
 0x8a3   :  { %v962_v51 = vmul.f32 1.442695, %v961_v49  ;;  %2068 = vpow2.f32 %v981_v50 }
 0x8a5   :  { %2070 = vpow2.f32 %v962_v51 }
 0x8ad   :  { %v2069_v53 = vpop.eup %2068 }
 0x8ae   :  { %v986_v54 = vmul.f32 %v2069_v53, %v984_v52 }
 0x8af   :  { %v2071_v55 = vpop.eup %2070 }
 0x8b0   :  { %988 = vrot.lane.b32.xlu0 %v986_v54, %s2157_s8  ;;  %v964_v56 = vadd.f32 1.0, %v2071_v55 }
 0x8b2   :  { %2072 = vlog2.f32 %v964_v56 }
 0x8bc   :  { %v2073_v58 = vpop.eup %2072 }
 0x8bd   :  { %v966_v60 = vmul.f32 0.6931472, %v2073_v58 }
 0x8bf   :  { %v967_v62 = vadd.f32 %v966_v60, %v959_v59 }
 0x8c1   :  { %1623 = vst.msk [vmem:[#allocation7] sm:$0xff] %vm1622_vm5, %v967_v62 }
 0x8c2   :  { %1625 = vst.msk [vmem:[#allocation7] sm:$0xff] %vm1624_vm6, %v956_v45 }
 0x8cf   :  { %1129 = vadd.xlane.f32.xlu0 %v1128_v4 }
 0x922   :  { %v989_v5 = vpop.permute.xlu0 %988 }
 0x923   :  { %v991_v6 = vadd.f32 %v989_v5, %v967_v62 }
 0x925   :  { %v992_v8 = vmax.f32 %v991_v6, 0.0 }
 0x927   :  { %v2315_v9 = vmin.f32 %v992_v8, 1.0 }
 0x929   :  { %v2320_v12 = vsub.f32 0.0, %v2315_v9 }
 0x92b   :  { %v1110_v14 = vmul.f32 0.0, %v2320_v12 }
 0x92d   :  { %v1111_v15 = vadd.f32 %v1110_v14, %v1107_v13 }
 0x92f   :  { %v1112_v17 = vmul.f32 0.1, %v1111_v15 }
 0x931   :  { %v1132_v18 = vmul.f32 0.1, %v1112_v17  ;;  %v1134_v22 = vmul.f32 %v1112_v17, %v2320_v12 }
 0x933   :  { %v1133_v19 = vadd.f32 %v1132_v18, %v2214_v7 }
 0x935   :  { %1143 = vperm.xlu1 %2064, %v1133_v19  }
 0x95c   :  { %v1130_v20 = vpop.xlane.xlu0 %1129 }
 0x95d   :  { %v1131_v21 = vadd.f32 %v2317_v10, %v1130_v20 }
 0x95f   :  { %v1135_v23 = vadd.f32 %v1134_v22, %v1131_v21 }
 0x961   :  { %v1136_v24 = vmul.f32 0.1, %v1135_v23 }
 0x963   :  { %v1137_v26 = vadd.f32 %v1136_v24, %v1112_v17 }
 0x965   :  { %v1156_v27 = vmul.f32 0.1, %v1137_v26  ;;  %v1158_v45 = vmul.f32 %v1137_v26, %v2320_v12 }
 0x967   :  { %v1157_v28 = vadd.f32 %v1156_v27, %v1133_v19 }
 0x969   :  { %1167 = vperm.xlu0 %2065, %v1157_v28  }
 0x9b4   :  { %v2327_v30 = vpop.permute.xlu1 %1143 }
 0x9b5   :  { %v1148_v31 = vmul.f32 %v2292_v25, %v2327_v30 }
 0x9b7   :  { %v1149_v32 = vadd.f32 %v1148_v31, %v2298_v34 }
 0x9b9   :  { %v1150_v7 = vmax.f32 %v1149_v32, 0.0 }
 0x9bb   :  { %v1151_v33 = vmul.f32 %v2304_v38, %v1150_v7 }
 0x9bd   :  { %v1152_v35 = vsel %vm545_vm3, %v1151_v33, 0.0 }
 0x9be   :  { %1153 = vadd.xlane.f32.xlu1 %v1152_v35  ;;  %v1077_v35 = vlaneseq }
 0x9e8   :  { %v2334_v36 = vpop.permute.xlu0 %1167 }
 0x9e9   :  { %v1172_v39 = vmul.f32 %v2292_v25, %v2334_v36 }
 0x9eb   :  { %v1173_v40 = vadd.f32 %v1172_v39, %v2298_v34  ;;  %v2357_v39 = vand.u32 127, %v1077_v35 }
 0x9ed   :  { %v1174_v41 = vmax.f32 %v1173_v40, 0.0  ;;  %vm1079_vm7 = vcmp.eq.s32.totalorder %v2357_v39, 0  ;;  %vm1114_vm8 = vcmp.eq.s32.totalorder %v2357_v39, 1  ;;  %vm1138_vm9 = vcmp.eq.s32.totalorder %v2357_v39, 2 }
 0x9ee   :  { %v1675_v40 = vsel %vm1079_vm7, 1.0, %v2152_v1  ;;  %vm1162_vm10 = vcmp.eq.s32.totalorder %v2357_v39, 3  ;;  %vm1186_vm11 = vcmp.eq.s32.totalorder %v2357_v39, 4  ;;  %vm1210_vm12 = vcmp.eq.s32.totalorder %v2357_v39, 5 }
 0x9ef   :  { %v1175_v42 = vmul.f32 %v2304_v38, %v1174_v41  ;;  %v1679_v41 = vsel %vm1114_vm8, 1.0, %v2152_v1  ;;  %vm1234_vm13 = vcmp.eq.s32.totalorder %v2357_v39, 6  ;;  %vm1258_vm14 = vcmp.eq.s32.totalorder %v2357_v39, 7 }
 0x9f0   :  { %vm1282_vm15 = vcmp.eq.s32.totalorder %v2357_v39, 8  ;;  %vm1306_vm0 = vcmp.eq.s32.totalorder %v2357_v39, 9  ;;  %vm1330_vm1 = vcmp.eq.s32.totalorder %v2357_v39, 10  ;;  %vm1354_vm2 = vcmp.eq.s32.totalorder %v2357_v39, 11 }
 0x9f1   :  { %v1176_v43 = vsel %vm545_vm3, %v1175_v42, 0.0  ;;  %v1680_v42 = vsel %vm1138_vm9, 1.0, %v2152_v1  ;;  %vm1378_vm4 = vcmp.eq.s32.totalorder %v2357_v39, 12  ;;  %vm1426_vm5 = vcmp.eq.s32.totalorder %v2357_v39, 14 }
 0x9f2   :  { %1177 = vadd.xlane.f32.xlu0 %v1176_v43  ;;  %v1086_v43 = vmul.f32 %v1675_v40, %v2294_v29  ;;  %vm1438_vm6 = vcmp.eq.s32.totalorder %v2357_v39, 15  ;;  %vm1629_vm7 = vcmask 146448   ;;  %vm1635_vm8 = vcmask 277648  }
 0xa4b   :  { %v1154_v44 = vpop.xlane.xlu1 %1153 }
 0xa4c   :  { %v1155_v46 = vadd.f32 %v2317_v10, %v1154_v44  ;;  %v1122_v44 = vmul.f32 %v1679_v41, %v2308_v57 }
 0xa4e   :  { %v1159_v47 = vadd.f32 %v1158_v45, %v1155_v46  ;;  %v1681_v45 = vsel %vm1162_vm10, 1.0, %v2152_v1  ;;  %v1146_v46 = vmul.f32 %v1680_v42, %v2327_v30 }
 0xa50   :  { %v1160_v48 = vmul.f32 0.1, %v1159_v47  ;;  %v1682_v47 = vsel %vm1186_vm11, 1.0, %v2152_v1 }
 0xa52   :  { %v1161_v49 = vadd.f32 %v1160_v48, %v1137_v26  ;;  %v1123_v48 = vadd.f32 %v1122_v44, %v1086_v43 }
 0xa54   :  { %v1180_v50 = vmul.f32 0.1, %v1161_v49  ;;  %v1182_v53 = vmul.f32 %v1161_v49, %v2320_v12 }
 0xa56   :  { %v1181_v51 = vadd.f32 %v1180_v50, %v1157_v28  ;;  %v1683_v50 = vsel %vm1210_vm12, 1.0, %v2152_v1 }
 0xa58   :  { %1191 = vperm.xlu1 %2064, %v1181_v51  }
 0xa7f   :  { %v1178_v52 = vpop.xlane.xlu0 %1177 }
 0xa80   :  { %v1179_v54 = vadd.f32 %v2317_v10, %v1178_v52 }
 0xa82   :  { %v1183_v55 = vadd.f32 %v1182_v53, %v1179_v54  ;;  %v1684_v53 = vsel %vm1234_vm13, 1.0, %v2152_v1 }
 0xa84   :  { %v1184_v56 = vmul.f32 0.1, %v1183_v55 }
 0xa86   :  { %v1185_v58 = vadd.f32 %v1184_v56, %v1161_v49  ;;  %v1170_v49 = vmul.f32 %v1681_v45, %v2334_v36 }
 0xa88   :  { %v1204_v59 = vmul.f32 0.1, %v1185_v58  ;;  %v1206_v17 = vmul.f32 %v1185_v58, %v2320_v12 }
 0xa8a   :  { %v1205_v60 = vadd.f32 %v1204_v59, %v1181_v51  ;;  %v1147_v51 = vadd.f32 %v1146_v46, %v1123_v48 }
 0xa8c   :  { %1215 = vperm.xlu1 %2064, %v1205_v60   ;;  %v1171_v29 = vadd.f32 %v1170_v49, %v1147_v51 }
 0xad7   :  { %v1192_v61 = vpop.permute.xlu1 %1191 }
 0xad8   :  { %v1196_v62 = vmul.f32 %v2292_v25, %v1192_v61  ;;  %v1194_v52 = vmul.f32 %v1682_v47, %v1192_v61 }
 0xada   :  { %v1197_v63 = vadd.f32 %v1196_v62, %v2298_v34  ;;  %v1195_v54 = vadd.f32 %v1194_v52, %v1171_v29 }
 0xadc   :  { %v1198_v2 = vmax.f32 %v1197_v63, 0.0 }
 0xade   :  { %v1199_v3 = vmul.f32 %v2304_v38, %v1198_v2 }
 0xae0   :  { %v1200_v4 = vsel %vm545_vm3, %v1199_v3, 0.0 }
 0xae1   :  { %1201 = vadd.xlane.f32.xlu1 %v1200_v4 }
 0xb0b   :  { %v1216_v5 = vpop.permute.xlu1 %1215 }
 0xb0c   :  { %v1220_v6 = vmul.f32 %v2292_v25, %v1216_v5  ;;  %v1218_v57 = vmul.f32 %v1683_v50, %v1216_v5 }
 0xb0e   :  { %v1221_v8 = vadd.f32 %v1220_v6, %v2298_v34  ;;  %v1219_v30 = vadd.f32 %v1218_v57, %v1195_v54 }
 0xb10   :  { %v1222_v11 = vmax.f32 %v1221_v8, 0.0 }
 0xb12   :  { %v1223_v13 = vmul.f32 %v2304_v38, %v1222_v11 }
 0xb14   :  { %v1224_v14 = vsel %vm545_vm3, %v1223_v13, 0.0 }
 0xb15   :  { %1225 = vadd.xlane.f32.xlu0 %v1224_v14 }
 0xb6e   :  { %v1202_v15 = vpop.xlane.xlu1 %1201 }
 0xb6f   :  { %v1203_v18 = vadd.f32 %v2317_v10, %v1202_v15 }
 0xb71   :  { %v1207_v19 = vadd.f32 %v1206_v17, %v1203_v18 }
 0xb73   :  { %v1208_v20 = vmul.f32 0.1, %v1207_v19 }
 0xb75   :  { %v1209_v21 = vadd.f32 %v1208_v20, %v1185_v58 }
 0xb77   :  { %v1228_v22 = vmul.f32 0.1, %v1209_v21  ;;  %v1230_v27 = vmul.f32 %v1209_v21, %v2320_v12 }
 0xb79   :  { %v1229_v23 = vadd.f32 %v1228_v22, %v1205_v60 }
 0xb7b   :  { %1239 = vperm.xlu0 %2065, %v1229_v23  }
 0xba2   :  { %v1226_v24 = vpop.xlane.xlu0 %1225 }
 0xba3   :  { %v1227_v26 = vadd.f32 %v2317_v10, %v1226_v24 }
 0xba5   :  { %v1231_v28 = vadd.f32 %v1230_v27, %v1227_v26 }
 0xba7   :  { %v1232_v31 = vmul.f32 0.1, %v1231_v28 }
 0xba9   :  { %v1233_v32 = vadd.f32 %v1232_v31, %v1209_v21  ;;  %v1685_v31 = vsel %vm1258_vm14, 1.0, %v2152_v1 }
 0xbab   :  { %v1252_v7 = vmul.f32 0.1, %v1233_v32  ;;  %v1254_v11 = vmul.f32 %v1233_v32, %v2320_v12 }
 0xbad   :  { %v1253_v33 = vadd.f32 %v1252_v7, %v1229_v23  ;;  %v1686_v7 = vsel %vm1282_vm15, 1.0, %v2152_v1 }
 0xbaf   :  { %1263 = vperm.xlu0 %2065, %v1253_v33  }
 0xbfa   :  { %v1240_v55 = vpop.permute.xlu0 %1239 }
 0xbfb   :  { %v1242_v56 = vmul.f32 %v1684_v53, %v1240_v55  ;;  %v1244_v58 = vmul.f32 %v2292_v25, %v1240_v55 }
 0xbfd   :  { %v1243_v59 = vadd.f32 %v1242_v56, %v1219_v30  ;;  %v1245_v60 = vadd.f32 %v1244_v58, %v2298_v34 }
 0xbff   :  { %v1246_v36 = vmax.f32 %v1245_v60, 0.0 }
 0xc01   :  { %v1247_v62 = vmul.f32 %v2304_v38, %v1246_v36 }
 0xc03   :  { %v1248_v61 = vsel %vm545_vm3, %v1247_v62, 0.0 }
 0xc04   :  { %1249 = vadd.xlane.f32.xlu0 %v1248_v61 }
 0xc2e   :  { %v1264_v63 = vpop.permute.xlu0 %1263 }
 0xc2f   :  { %v1268_v2 = vmul.f32 %v2292_v25, %v1264_v63 }
 0xc31   :  { %v1269_v3 = vadd.f32 %v1268_v2, %v2298_v34 }
 0xc33   :  { %v1270_v4 = vmax.f32 %v1269_v3, 0.0 }
 0xc35   :  { %v1271_v5 = vmul.f32 %v2304_v38, %v1270_v4  ;;  %v1687_v4 = vsel %vm1306_vm0, 1.0, %v2152_v1 }
 0xc37   :  { %v1272_v6 = vsel %vm545_vm3, %v1271_v5, 0.0 }
 0xc38   :  { %1273 = vadd.xlane.f32.xlu1 %v1272_v6  ;;  %v1688_v6 = vsel %vm1330_vm1, 1.0, %v2152_v1 }
 0xc91   :  { %v1250_v8 = vpop.xlane.xlu0 %1249 }
 0xc92   :  { %v1251_v13 = vadd.f32 %v2317_v10, %v1250_v8 }
 0xc94   :  { %v1255_v14 = vadd.f32 %v1254_v11, %v1251_v13 }
 0xc96   :  { %v1256_v15 = vmul.f32 0.1, %v1255_v14 }
 0xc98   :  { %v1257_v17 = vadd.f32 %v1256_v15, %v1233_v32  ;;  %v1266_v32 = vmul.f32 %v1685_v31, %v1264_v63  ;;  %v1539_v31 = vld [vmem:[#allocation5 + $0x278] sm:$0xff] }
 0xc9a   :  { %v1276_v18 = vmul.f32 0.1, %v1257_v17  ;;  %v1278_v22 = vmul.f32 %v1257_v17, %v2320_v12  ;;  %v1267_v35 = vadd.f32 %v1266_v32, %v1243_v59 }
 0xc9c   :  { %v1277_v19 = vadd.f32 %v1276_v18, %v1253_v33 }
 0xc9e   :  { %1287 = vperm.xlu1 %2064, %v1277_v19  }
 0xcc5   :  { %v1274_v20 = vpop.xlane.xlu1 %1273 }
 0xcc6   :  { %v1275_v21 = vadd.f32 %v2317_v10, %v1274_v20 }
 0xcc8   :  { %v1279_v23 = vadd.f32 %v1278_v22, %v1275_v21 }
 0xcca   :  { %v1280_v24 = vmul.f32 0.1, %v1279_v23 }
 0xccc   :  { %v1281_v26 = vadd.f32 %v1280_v24, %v1257_v17 }
 0xcce   :  { %v1300_v27 = vmul.f32 0.1, %v1281_v26  ;;  %v1302_v57 = vmul.f32 %v1281_v26, %v2320_v12 }
 0xcd0   :  { %v1301_v28 = vadd.f32 %v1300_v27, %v1277_v19 }
 0xcd2   :  { %1311 = vperm.xlu1 %2064, %v1301_v28  }
 0xd1d   :  { %v1288_v33 = vpop.permute.xlu1 %1287 }
 0xd1e   :  { %v1290_v40 = vmul.f32 %v1686_v7, %v1288_v33  ;;  %v1292_v41 = vmul.f32 %v2292_v25, %v1288_v33  ;;  %v1540_v7 = vld [vmem:[#allocation5 + $0x280] sm:$0xff]  ;;  %v1541_v33 = vld [vmem:[#allocation5 + $0x288] sm:$0xff] }
 0xd20   :  { %v1291_v42 = vadd.f32 %v1290_v40, %v1267_v35  ;;  %v1293_v43 = vadd.f32 %v1292_v41, %v2298_v34  ;;  %v2047_v35 = vpack.c.bf16 %v1541_v33, %v1540_v7 }
 0xd22   :  { %v1294_v44 = vmax.f32 %v1293_v43, 0.0 }
 0xd24   :  { %v1295_v45 = vmul.f32 %v2304_v38, %v1294_v44 }
 0xd26   :  { %v1296_v46 = vsel %vm545_vm3, %v1295_v45, 0.0 }
 0xd27   :  { %1297 = vadd.xlane.f32.xlu1 %v1296_v46 }
 0xd51   :  { %v1312_v47 = vpop.permute.xlu1 %1311 }
 0xd52   :  { %v1316_v48 = vmul.f32 %v2292_v25, %v1312_v47  ;;  %v1314_v5 = vmul.f32 %v1687_v4, %v1312_v47 }
 0xd54   :  { %v1317_v49 = vadd.f32 %v1316_v48, %v2298_v34  ;;  %v1315_v11 = vadd.f32 %v1314_v5, %v1291_v42 }
 0xd56   :  { %v1318_v50 = vmax.f32 %v1317_v49, 0.0  ;;  %v1694_v49 = vld [vmem:[#allocation5 + $0x258] ss:$0 sm:$0xff] }
 0xd58   :  { %v1319_v51 = vmul.f32 %v2304_v38, %v1318_v50 }
 0xd5a   :  { %v1320_v52 = vsel %vm545_vm3, %v1319_v51, 0.0 }
 0xd5b   :  { %1321 = vadd.xlane.f32.xlu0 %v1320_v52 }
 0xdb4   :  { %v1298_v29 = vpop.xlane.xlu1 %1297 }
 0xdb5   :  { %v1299_v53 = vadd.f32 %v2317_v10, %v1298_v29 }
 0xdb7   :  { %v1303_v54 = vadd.f32 %v1302_v57, %v1299_v53  ;;  %v1696_v57 = vld [vmem:[#allocation5 + $0x268] ss:$0 sm:$0xff] }
 0xdb9   :  { %v1304_v55 = vmul.f32 0.1, %v1303_v54 }
 0xdbb   :  { %v1305_v30 = vadd.f32 %v1304_v55, %v1281_v26 }
 0xdbd   :  { %v1324_v56 = vmul.f32 0.1, %v1305_v30  ;;  %v1326_v36 = vmul.f32 %v1305_v30, %v2320_v12 }
 0xdbf   :  { %v1325_v58 = vadd.f32 %v1324_v56, %v1301_v28  ;;  %v1538_v28 = vld [vmem:[#allocation5 + $0x270] sm:$0xff] }
 0xdc0   :  { %v2044_v32 = vpack.c.bf16 %v1539_v31, %v1538_v28 }
 0xdc1   :  { %1335 = vperm.xlu0 %2065, %v1325_v58  }
 0xdc2   :  { %2045 = vmatpush3.bf16.msra.mxu0 %v2044_v32 }
 0xdc3   :  { %2046 = vmatprep.subr.bf16.mxu0 %v2150_v0 }
 0xdc6   :  { %2048 = vmatpush3.bf16.msra.mxu0 %v2047_v35 }
 0xde8   :  { %v1322_v59 = vpop.xlane.xlu0 %1321 }
 0xde9   :  { %v1323_v60 = vadd.f32 %v2317_v10, %v1322_v59  ;;  %v1689_v59 = vsel %vm1354_vm2, 1.0, %v2152_v1 }
 0xdeb   :  { %v1327_v62 = vadd.f32 %v1326_v36, %v1323_v60  ;;  %v1690_v36 = vsel %vm1378_vm4, 1.0, %v2152_v1 }
 0xded   :  { %v1328_v61 = vmul.f32 0.1, %v1327_v62 }
 0xdef   :  { %v1329_v63 = vadd.f32 %v1328_v61, %v1305_v30 }
 0xdf1   :  { %v1348_v2 = vmul.f32 0.1, %v1329_v63  ;;  %v1350_v41 = vmul.f32 %v1329_v63, %v2320_v12 }
 0xdf3   :  { %v1349_v3 = vadd.f32 %v1348_v2, %v1325_v58 }
 0xdf5   :  { %1359 = vperm.xlu0 %2065, %v1349_v3  }
 0xe40   :  { %v1336_v8 = vpop.permute.xlu0 %1335 }
 0xe41   :  { %v1338_v13 = vmul.f32 %v1688_v6, %v1336_v8  ;;  %v1340_v14 = vmul.f32 %v2292_v25, %v1336_v8 }
 0xe43   :  { %v1339_v15 = vadd.f32 %v1338_v13, %v1315_v11  ;;  %v1341_v17 = vadd.f32 %v1340_v14, %v2298_v34 }
 0xe45   :  { %v1342_v18 = vmax.f32 %v1341_v17, 0.0 }
 0xe47   :  { %v1343_v19 = vmul.f32 %v2304_v38, %v1342_v18 }
 0xe49   :  { %v1344_v20 = vsel %vm545_vm3, %v1343_v19, 0.0 }
 0xe4a   :  { %1345 = vadd.xlane.f32.xlu0 %v1344_v20 }
 0xe74   :  { %v1360_v21 = vpop.permute.xlu0 %1359 }
 0xe75   :  { %v1364_v22 = vmul.f32 %v2292_v25, %v1360_v21  ;;  %v1362_v60 = vmul.f32 %v1689_v59, %v1360_v21 }
 0xe77   :  { %v1365_v23 = vadd.f32 %v1364_v22, %v2298_v34  ;;  %v1363_v61 = vadd.f32 %v1362_v60, %v1339_v15 }
 0xe79   :  { %v1366_v24 = vmax.f32 %v1365_v23, 0.0 }
 0xe7b   :  { %v1367_v26 = vmul.f32 %v2304_v38, %v1366_v24 }
 0xe7d   :  { %v1368_v27 = vsel %vm545_vm3, %v1367_v26, 0.0 }
 0xe7e   :  { %1369 = vadd.xlane.f32.xlu1 %v1368_v27 }
 0xe8f   :  { %1451 = vperm.xlu1 %2064, %v2315_v9  }
 0xed7   :  { %v1346_v40 = vpop.xlane.xlu0 %1345 }
 0xed8   :  { %v1347_v42 = vadd.f32 %v2317_v10, %v1346_v40 }
 0xeda   :  { %v1351_v43 = vadd.f32 %v1350_v41, %v1347_v42  ;;  %v1692_v41 = vsel %vm1426_vm5, 1.0, %v2152_v1 }
 0xedc   :  { %v1352_v44 = vmul.f32 0.1, %v1351_v43  ;;  %v1693_v43 = vsel %vm1438_vm6, 1.0, %v2152_v1 }
 0xede   :  { %v1353_v45 = vadd.f32 %v1352_v44, %v1329_v63 }
 0xee0   :  { %v1372_v46 = vmul.f32 0.1, %v1353_v45  ;;  %v1374_v0 = vmul.f32 %v1353_v45, %v2320_v12 }
 0xee2   :  { %v1373_v47 = vadd.f32 %v1372_v46, %v1349_v3 }
 0xee4   :  { %1383 = vperm.xlu1 %2064, %v1373_v47  }
 0xf0b   :  { %v1370_v9 = vpop.xlane.xlu1 %1369 }
 0xf0c   :  { %v1371_v48 = vadd.f32 %v2317_v10, %v1370_v9 }
 0xf0e   :  { %v1375_v50 = vadd.f32 %v1374_v0, %v1371_v48 }
 0xf0f   :  { %v1452_v51 = vpop.permute.xlu1 %1451 }
 0xf10   :  { %v1376_v52 = vmul.f32 0.1, %v1375_v50  ;;  %v1458_v29 = vmul.f32 %v1694_v49, %v1452_v51 }
 0xf12   :  { %v1377_v53 = vadd.f32 %v1376_v52, %v1353_v45  ;;  %v1530_v54 = vadd.f32 %v2302_v37, %v1458_v29  ;;  %v1697_v45 = vld [vmem:[#allocation5 + $0x290] ss:$0 sm:$0xff] }
 0xf14   :  { %v1536_v55 = vadd.f32 %v1696_v57, %v1530_v54  ;;  %v1396_v30 = vmul.f32 0.1, %v1377_v53  ;;  %v1398_v21 = vmul.f32 %v1377_v53, %v2320_v12 }
 0xf16   :  { %v1537_v56 = vmax.f32 %v1536_v55, 0.0  ;;  %v1397_v58 = vadd.f32 %v1396_v30, %v1373_v47 }
 0xf18   :  { %1951 = vmatmul.mubr.msk.f32.vlgmr.msra.gmra.mrb[18].mxu0 %vm545_vm3, %v1537_v56  ;;  %1407 = vperm.xlu1 %2064, %v1397_v58  }
 0xf63   :  { %v1384_v62 = vpop.permute.xlu1 %1383 }
 0xf64   :  { %v1386_v63 = vmul.f32 %v1690_v36, %v1384_v62  ;;  %v1388_v37 = vmul.f32 %v2292_v25, %v1384_v62 }
 0xf66   :  { %v1387_v2 = vadd.f32 %v1386_v63, %v1363_v61  ;;  %v1389_v3 = vadd.f32 %v1388_v37, %v2298_v34 }
 0xf68   :  { %v1390_v4 = vmax.f32 %v1389_v3, 0.0 }
 0xf6a   :  { %v1391_v5 = vmul.f32 %v2304_v38, %v1390_v4 }
 0xf6c   :  { %v1392_v6 = vsel %vm545_vm3, %v1391_v5, 0.0 }
 0xf6d   :  { %1393 = vadd.xlane.f32.xlu0 %v1392_v6 }
 0xf97   :  { %v1408_v8 = vpop.permute.xlu1 %1407 }
 0xf98   :  { %v1412_v11 = vmul.f32 %v2292_v25, %v1408_v8 }
 0xf9a   :  { %v1413_v13 = vadd.f32 %v1412_v11, %v2298_v34 }
 0xf9c   :  { %v1414_v14 = vmax.f32 %v1413_v13, 0.0 }
 0xf9e   :  { %v1415_v15 = vmul.f32 %v2304_v38, %v1414_v14 }
 0xfa0   :  { %v1416_v17 = vsel %vm545_vm3, %v1415_v15, 0.0  ;;  %vm1402_vm3 = vcmp.eq.s32.totalorder %v2357_v39, 13 }
 0xfa1   :  { %1417 = vadd.xlane.f32.xlu1 %v1416_v17  ;;  %v1691_v40 = vsel %vm1402_vm3, 1.0, %v2152_v1 }
 0xfa2   :  { %v1410_v42 = vmul.f32 %v1691_v40, %v1408_v8 }
 0xfa4   :  { %v1411_v44 = vadd.f32 %v1410_v42, %v1387_v2 }
 0xfeb   :  { %v1616_v18 = vpop.f32.mrb[18].mxu0 }
 0xfec   :  { %v1952_v19 = vpop.f32.mrb[19].mxu0  ;;  %v1617_v9 = vadd.f32 %v1697_v45, %v1616_v18 }
 0xffa   :  { %v1394_v20 = vpop.xlane.xlu0 %1393 }
 0xffb   :  { %v1395_v22 = vadd.f32 %v2317_v10, %v1394_v20 }
 0xffd   :  { %v1399_v23 = vadd.f32 %v1398_v21, %v1395_v22 }
 0xfff   :  { %v1400_v24 = vmul.f32 0.1, %v1399_v23 }
0x1001   :  { %v1401_v26 = vadd.f32 %v1400_v24, %v1377_v53 }
0x1003   :  { %v1420_v27 = vmul.f32 0.1, %v1401_v26  ;;  %v1422_v28 = vmul.f32 %v1401_v26, %v2320_v12 }
0x1005   :  { %v1421_v25 = vadd.f32 %v1420_v27, %v1397_v58 }
0x1007   :  { %1431 = vperm.xlu0 %2065, %v1421_v25  }
0x102e   :  { %v1418_v34 = vpop.xlane.xlu1 %1417 }
0x102f   :  { %v1419_v38 = vadd.f32 %v2317_v10, %v1418_v34 }
0x1031   :  { %v1423_v31 = vadd.f32 %v1422_v28, %v1419_v38 }
0x1033   :  { %v1424_v32 = vmul.f32 0.1, %v1423_v31 }
0x1035   :  { %v1425_v7 = vadd.f32 %v1424_v32, %v1401_v26 }
0x1037   :  { %v1436_v33 = vmul.f32 0.1, %v1425_v7 }
0x1039   :  { %v1437_v35 = vadd.f32 %v1436_v33, %v1421_v25 }
0x103b   :  { %1443 = vperm.xlu0 %2065, %v1437_v35  }
0x103f   :  { %1626 = vrot.lane.b32.xlu0 %v2247_v16, %s2158_s9 }
0x1086   :  { %v1432_v12 = vpop.permute.xlu0 %1431 }
0x1087   :  { %v1434_v10 = vmul.f32 %v1692_v41, %v1432_v12 }
0x1089   :  { %v1435_v47 = vadd.f32 %v1434_v10, %v1411_v44 }
0x10ba   :  { %v1444_v46 = vpop.permute.xlu0 %1443 }
0x10bb   :  { %v1446_v16 = vmul.f32 %v1693_v43, %v1444_v46 }
0x10bd   :  { %v1447_v48 = vadd.f32 %v1446_v16, %v1435_v47 }
0x10be   :  { %v1627_v0 = vpop.permute.xlu0 %1626 }
0x10bf   :  { %1630 = vst.msk [vmem:[#allocation7] sm:$0xff] %vm1629_vm7, %v1627_v0  ;;  %v1620_v49 = vadd.f32 %v1617_v9, %v1447_v48 }
0x10c1   :  { %1632 = vrot.lane.b32.xlu0 %v1620_v49, %s2159_s10 }
0x1133   :  { %v1633_v39 = vpop.permute.xlu0 %1632 }
0x1134   :  { %1636 = vst.msk [vmem:[#allocation7] sm:$0xff] %vm1635_vm8, %v1633_v39 }
0x1135   :  { %2129 = shalt.err (!%p2126_p6)
}
0x1136   :  { %s2130_s16 = scalar_lea.hbm %s2462_s2, 128 }
0x1137   :  { %p2131_p7 = scmp.ne.s32.totalorder %s2462_s2, %s2130_s16  ;;  %p2134_p8 = scmp.lt.u32.totalorder %s2130_s16, %s2462_s2 }
0x1139   :  { %p2136_p9 = pnand %p2134_p8, %p2131_p7 }
0x113b   :  { %2139 = shalt.err (!%p2136_p9)
}
0x113c   :  { %1646 = dma.vmem_to_hbm [thread:$0]  %s1644_s12, 128, %s2462_s2, [#allocation4]  }
0x113d   :  { %2144 = dma.done.wait [#allocation4], 128  }
0x113e   :  { %2145 = vsyncadd [#allocation4], 4294967168 }
0x113f   :  { %1650 = vsyncpa [#allocation3], 1 }
0x1140   :  { %1651 = vsyncpa [#allocation6], 1 }
0x1141   :  { %1652 = vsyncpa [#allocation4], 1 }

</bundles_post_ra>
